<compile_context>
chip_gen: v7x
topology: tpu7x:2x2x1
jax: 0.10.0
libtpu: 0.0.40
codegen_flags: <defaults>
</compile_context>

<pallas_src>
import jax
import jax.numpy as jnp
from jax.experimental import pallas as pl
from jax.experimental.pallas import tpu as pltpu


def _round_up(x, m):
    return (x + m - 1) // m * m


def amazon_kernel(x_ref, w_pre_ref, b_pre_ref, w2_ref, b2_ref, o_ref):
    # x_ref:     [B, D_in_p]      flattened image (bf16)
    # w_pre_ref: [D_in_p, H_p]    synthetic backbone weights (bf16)
    # b_pre_ref: [1, H_p]         backbone bias (f32)
    # w2_ref:    [H_p, L_p]       fc2 weights (bf16)
    # b2_ref:    [1, L_p]         fc2 bias (f32)
    # o_ref:     [B, L_p]         sigmoid(fc2(relu(backbone(x)))) (f32)
    feats = jnp.dot(x_ref[...], w_pre_ref[...],
                    preferred_element_type=jnp.float32)
    feats = jnp.maximum(feats + b_pre_ref[...], 0.0)          # relu (idempotent)
    logits = jnp.dot(feats.astype(jnp.bfloat16), w2_ref[...],
                     preferred_element_type=jnp.float32)
    o_ref[...] = jax.nn.sigmoid(logits + b2_ref[...])


def prepare_params(params):
    """One-time padding + bf16 casting of the weights (hoisted off the
    per-call forward path).  Zero padding is exact: padded hidden units have
    bias 0 and relu(0)=0, and their w2 rows are 0; padded label columns are
    sliced off in the wrapper."""
    w_pre, b_pre = params["w_pre"], params["b_pre"]
    w2, b2 = params["w2"], params["b2"]
    d_in, hidden = w_pre.shape
    num_labels = w2.shape[1]

    d_in_p = _round_up(d_in, 128)
    h_p = _round_up(hidden, 128)
    l_p = _round_up(num_labels, 128)

    w_pre_p = jnp.zeros((d_in_p, h_p), jnp.bfloat16).at[:d_in, :hidden].set(
        w_pre.astype(jnp.bfloat16))
    b_pre_p = jnp.zeros((1, h_p), jnp.float32).at[:, :hidden].set(b_pre)
    w2_p = jnp.zeros((h_p, l_p), jnp.bfloat16).at[:hidden, :num_labels].set(
        w2.astype(jnp.bfloat16))
    b2_p = jnp.zeros((1, l_p), jnp.float32).at[:, :num_labels].set(b2)

    return {
        "w_pre_p": w_pre_p, "b_pre_p": b_pre_p,
        "w2_p": w2_p, "b2_p": b2_p,
        "d_in": d_in, "d_in_p": d_in_p, "num_labels": num_labels, "l_p": l_p,
    }


def amazon_forward(x_nchw, prepared):
    B = x_nchw.shape[0]
    x_flat = x_nchw.reshape(B, -1)
    d_in, d_in_p = prepared["d_in"], prepared["d_in_p"]
    num_labels, l_p = prepared["num_labels"], prepared["l_p"]

    # Per-call: only the (tiny) activation needs padding / casting.
    x_p = jnp.zeros((B, d_in_p), jnp.bfloat16).at[:, :d_in].set(
        x_flat.astype(jnp.bfloat16))

    w_pre_p = prepared["w_pre_p"]
    b_pre_p = prepared["b_pre_p"]
    w2_p = prepared["w2_p"]
    b2_p = prepared["b2_p"]
    h_p = w_pre_p.shape[1]

    out = pl.pallas_call(
        amazon_kernel,
        out_shape=jax.ShapeDtypeStruct((B, l_p), jnp.float32),
        grid=(1,),
        in_specs=[
            pl.BlockSpec((B, d_in_p), lambda n: (0, 0)),    # x
            pl.BlockSpec((d_in_p, h_p), lambda n: (0, 0)),  # w_pre (bf16)
            pl.BlockSpec((1, h_p), lambda n: (0, 0)),       # b_pre
            pl.BlockSpec((h_p, l_p), lambda n: (0, 0)),     # w2 (bf16)
            pl.BlockSpec((1, l_p), lambda n: (0, 0)),       # b2
        ],
        out_specs=pl.BlockSpec((B, l_p), lambda n: (0, 0)),
        compiler_params=pltpu.CompilerParams(
            dimension_semantics=("arbitrary",)),
    )(x_p, w_pre_p, b_pre_p, w2_p, b2_p)

    return out[:, :num_labels]


def init_params(key, in_dim, hidden=1000, num_labels=17):
    # PyTorch nn.Linear default init: U(-1/sqrt(fan_in), 1/sqrt(fan_in)).
    k = jax.random.split(key, 8)

    def linear(kw, kb, fan_in, fan_out):
        bound = 1.0 / jnp.sqrt(jnp.float32(fan_in))
        w = jax.random.uniform(kw, (fan_in, fan_out), jnp.float32, -bound, bound)
        b = jax.random.uniform(kb, (1, fan_out), jnp.float32, -bound, bound)
        return w, b

    w_pre, b_pre = linear(k[0], k[1], in_dim, hidden)   # synthetic backbone
    w1, b1 = linear(k[2], k[3], 2000, 1000)             # fc1 (unused in forward)
    w2, b2 = linear(k[4], k[5], hidden, num_labels)     # fc2
    return {"w_pre": w_pre, "b_pre": b_pre,
            "w1": w1, "b1": b1,          # parameter parity only, not applied
            "w2": w2, "b2": b2}


def reference_forward(x_nchw, params):
    # Pure-JAX reference mirroring the kernel's numerics (bf16 inputs to both
    # matmuls, f32 accumulation throughout).
    B = x_nchw.shape[0]
    x = x_nchw.reshape(B, -1).astype(jnp.bfloat16)
    w_pre = params["w_pre"].astype(jnp.bfloat16)
    f = jnp.dot(x, w_pre, preferred_element_type=jnp.float32) + params["b_pre"]
    f = jnp.maximum(f, 0.0)
    logits = jnp.dot(f.astype(jnp.bfloat16), params["w2"].astype(jnp.bfloat16),
                     preferred_element_type=jnp.float32) + params["b2"]
    return jax.nn.sigmoid(logits)


if __name__ == "__main__":
    key = jax.random.PRNGKey(0)
    kx, kp = jax.random.split(key)

    B, C, H, W = 2, 4, 16, 16
    x = jax.random.normal(kx, (B, C, H, W), jnp.float32)

    params = init_params(kp, in_dim=C * H * W, hidden=1000, num_labels=17)
    prepared = prepare_params(params)   # one-time padding / bf16 casting

    out = amazon_forward(x, prepared)
    out = jax.block_until_ready(out)

    ref = reference_forward(x, params)
    assert out.shape == (B, 17), out.shape
    assert jnp.allclose(out, ref, atol=5e-3, rtol=5e-3), "mismatch vs reference"

    print("KERNEL_OK")
</pallas_src>

<mosaic_0001>
module attributes {stable_mosaic.version = 11 : i64} {
  func.func @amazon_kernel(%arg0: i32, %arg1: memref<2x1024xbf16, #tpu.memory_space<vmem>>, %arg2: memref<1024x1024xbf16, #tpu.memory_space<vmem>>, %arg3: memref<1x1024xf32, #tpu.memory_space<vmem>>, %arg4: memref<1024x128xbf16, #tpu.memory_space<vmem>>, %arg5: memref<1x128xf32, #tpu.memory_space<vmem>>, %arg6: memref<2x128xf32, #tpu.memory_space<vmem>>) attributes {dimension_semantics = [#tpu.dimension_semantics<arbitrary>], iteration_bounds = array<i64: 1>, scalar_prefetch = 0 : i64, scratch_operands = 0 : i64, tpu.core_type = #tpu.core_type<tc>, window_params = [{pipeline_mode = #tpu.pipeline_mode<synchronous>, transform_indices = @transform_0, window_bounds = array<i64: 2, 1024>}, {pipeline_mode = #tpu.pipeline_mode<synchronous>, transform_indices = @transform_1, window_bounds = array<i64: 1024, 1024>}, {pipeline_mode = #tpu.pipeline_mode<synchronous>, transform_indices = @transform_2, window_bounds = array<i64: 1, 1024>}, {pipeline_mode = #tpu.pipeline_mode<synchronous>, transform_indices = @transform_3, window_bounds = array<i64: 1024, 128>}, {pipeline_mode = #tpu.pipeline_mode<synchronous>, transform_indices = @transform_4, window_bounds = array<i64: 1, 128>}, {pipeline_mode = #tpu.pipeline_mode<synchronous>, transform_indices = @transform_5, window_bounds = array<i64: 2, 128>}]} {
    %c0 = arith.constant 0 : index
    %c0_0 = arith.constant 0 : index
    %0 = vector.load %arg1[%c0, %c0_0] : memref<2x1024xbf16, #tpu.memory_space<vmem>>, vector<2x1024xbf16>
    %c0_1 = arith.constant 0 : index
    %c0_2 = arith.constant 0 : index
    %1 = vector.load %arg2[%c0_1, %c0_2] : memref<1024x1024xbf16, #tpu.memory_space<vmem>>, vector<1024x1024xbf16>
    %cst = arith.constant dense<0.000000e+00> : vector<2x1024xf32>
    %2 = tpu.matmul %0, %1, %cst {dimension_numbers = #tpu.dot_dimension_numbers<[1], [0], [0], [1], [0, 0, 1, 1], [], []>} : vector<2x1024xbf16>, vector<1024x1024xbf16>, vector<2x1024xf32> -> vector<2x1024xf32>
    %c0_3 = arith.constant 0 : index
    %c0_4 = arith.constant 0 : index
    %3 = vector.load %arg3[%c0_3, %c0_4] : memref<1x1024xf32, #tpu.memory_space<vmem>>, vector<1x1024xf32>
    %4 = vector.broadcast %3 : vector<1x1024xf32> to vector<2x1024xf32>
    %5 = arith.addf %2, %4 : vector<2x1024xf32>
    %cst_5 = arith.constant 0.000000e+00 : f32
    %6 = vector.broadcast %cst_5 : f32 to vector<2x1024xf32>
    %7 = arith.maximumf %5, %6 : vector<2x1024xf32>
    %8 = arith.truncf %7 : vector<2x1024xf32> to vector<2x1024xbf16>
    %c0_6 = arith.constant 0 : index
    %c0_7 = arith.constant 0 : index
    %9 = vector.load %arg4[%c0_6, %c0_7] : memref<1024x128xbf16, #tpu.memory_space<vmem>>, vector<1024x128xbf16>
    %cst_8 = arith.constant dense<0.000000e+00> : vector<2x128xf32>
    %10 = tpu.matmul %8, %9, %cst_8 {dimension_numbers = #tpu.dot_dimension_numbers<[1], [0], [0], [1], [0, 0, 1, 1], [], []>} : vector<2x1024xbf16>, vector<1024x128xbf16>, vector<2x128xf32> -> vector<2x128xf32>
    %c0_9 = arith.constant 0 : index
    %c0_10 = arith.constant 0 : index
    %11 = vector.load %arg5[%c0_9, %c0_10] : memref<1x128xf32, #tpu.memory_space<vmem>>, vector<1x128xf32>
    %12 = vector.broadcast %11 : vector<1x128xf32> to vector<2x128xf32>
    %13 = arith.addf %10, %12 : vector<2x128xf32>
    %14 = arith.negf %13 : vector<2x128xf32>
    %15 = math.exp %14 : vector<2x128xf32>
    %cst_11 = arith.constant 1.000000e+00 : f32
    %16 = vector.broadcast %cst_11 : f32 to vector<2x128xf32>
    %17 = arith.addf %16, %15 : vector<2x128xf32>
    %18 = arith.divf %16, %17 : vector<2x128xf32>
    %c0_12 = arith.constant 0 : index
    %c0_13 = arith.constant 0 : index
    %19 = vector.load %arg6[%c0_12, %c0_13] : memref<2x128xf32, #tpu.memory_space<vmem>>, vector<2x128xf32>
    tpu.vector_store %arg6[%c0_12, %c0_13], %18 {strides = array<i32>} : memref<2x128xf32, #tpu.memory_space<vmem>>, vector<2x128xf32>,
    return
  }
  func.func @transform_0(%arg0: i32) -> (i32, i32) {
    %c0_i32 = arith.constant 0 : i32
    %c0_i32_0 = arith.constant 0 : i32
    %c0_i32_1 = arith.constant 0 : i32
    return %c0_i32, %c0_i32_0 : i32, i32
  }
  func.func @transform_1(%arg0: i32) -> (i32, i32) {
    %c0_i32 = arith.constant 0 : i32
    %c0_i32_0 = arith.constant 0 : i32
    %c0_i32_1 = arith.constant 0 : i32
    return %c0_i32, %c0_i32_0 : i32, i32
  }
  func.func @transform_2(%arg0: i32) -> (i32, i32) {
    %c0_i32 = arith.constant 0 : i32
    %c0_i32_0 = arith.constant 0 : i32
    %c0_i32_1 = arith.constant 0 : i32
    return %c0_i32, %c0_i32_0 : i32, i32
  }
  func.func @transform_3(%arg0: i32) -> (i32, i32) {
    %c0_i32 = arith.constant 0 : i32
    %c0_i32_0 = arith.constant 0 : i32
    %c0_i32_1 = arith.constant 0 : i32
    return %c0_i32, %c0_i32_0 : i32, i32
  }
  func.func @transform_4(%arg0: i32) -> (i32, i32) {
    %c0_i32 = arith.constant 0 : i32
    %c0_i32_0 = arith.constant 0 : i32
    %c0_i32_1 = arith.constant 0 : i32
    return %c0_i32, %c0_i32_0 : i32, i32
  }
  func.func @transform_5(%arg0: i32) -> (i32, i32) {
    %c0_i32 = arith.constant 0 : i32
    %c0_i32_0 = arith.constant 0 : i32
    %c0_i32_1 = arith.constant 0 : i32
    return %c0_i32, %c0_i32_0 : i32, i32
  }
}

</mosaic_0001>

<bundles_post_ra>
// kernel: tpu_custom_call.1
= control target key start
LH: loop header
LB: loop body
LE: loop exit
PB: predicated region body
PF: predicated region fallthrough
CT: control target
= control target key end

     0   :  { %10 = vsyncpa [#allocation3], 0  ;;  %s5794_s0 = inlined_call_operand.hbm [shape: bf16[2,1024], index: 0, kind: input, shape index: {}]   ;;  %s5795_s1 = inlined_call_operand.hbm [shape: bf16[1024,1024], index: 1, kind: input, shape index: {}]   ;;  %s5796_s2 = inlined_call_operand.hbm [shape: f32[1,1024], index: 2, kind: input, shape index: {}]   ;;  %s5797_s3 = inlined_call_operand.hbm [shape: bf16[1024,128], index: 3, kind: input, shape index: {}]   ;;  %s5798_s4 = inlined_call_operand.hbm [shape: f32[1,128], index: 4, kind: input, shape index: {}]   ;;  %s5799_s5 = inlined_call_operand.hbm [shape: f32[2,128], index: 5, kind: output, shape index: {}]  }
   0x1   :  { %11 = vsyncpa [#allocation6], 0 }
   0x2   :  { %12 = vsyncpa [#allocation9], 0 }
   0x3   :  { %13 = vsyncpa [#allocation4], 0  ;;  %s5574_s18 = smov [#allocation5]   ;;  %s5434_s22 = scalar_lea.hbm %s5795_s1, 65536 }
   0x4   :  { %s29_s19 = sshll.u32 %s5574_s18, 4  ;;  %p5435_p0 = scmp.ne.s32.totalorder %s5795_s1, %s5434_s22  ;;  %s30_s19 = int_to_ptr.vmem [resolvable:$true] %s29_s19 }
   0x5   :  { %p5438_p1 = scmp.lt.u32.totalorder %s5434_s22, %s5795_s1 }
   0x7   :  { %p5440_p2 = pnand %p5438_p1, %p5435_p0 }
   0x9   :  { %5443 = shalt.err (!%p5440_p2)
}
   0xa   :  { %s5444_s27 = scalar_lea.vmem %s30_s19, 65536  ;;  %p5449_p4 = scmp.lt.s32.totalorder %s30_s19, %s30_s19 }
   0xb   :  { %p5445_p3 = scmp.ne.s32.totalorder %s30_s19, %s5444_s27  ;;  %p5450_p5 = scmp.lt.s32.totalorder %s5444_s27, %s5444_s27 }
   0xd   :  { %p5451_p6 = por %p5450_p5, %p5449_p4 }
   0xf   :  { %p5452_p7 = pnand %p5451_p6, %p5445_p3 }
  0x11   :  { %5455 = shalt.err (!%p5452_p7)
}
  0x12   :  { %s5575_s28 = smov 512   ;;  %s5576_s29 = smov 32  }
  0x13   :  { %35 = dma.hbm_to_vmem [thread:$0]  %s5795_s1, 65536, %s30_s19, [#allocation6], %s5575_s28, %s5575_s28, %s5576_s29  }
  0x14   :  { %s5577_s7 = smov [#allocation8]   ;;  %s5456_s11 = scalar_lea.hbm %s5797_s3, 8192 }
  0x15   :  { %s51_s8 = sshll.u32 %s5577_s7, 4  ;;  %p5457_p8 = scmp.ne.s32.totalorder %s5797_s3, %s5456_s11  ;;  %s52_s8 = int_to_ptr.vmem [resolvable:$true] %s51_s8 }
  0x16   :  { %p5460_p9 = scmp.lt.u32.totalorder %s5456_s11, %s5797_s3 }
  0x18   :  { %p5462_p10 = pnand %p5460_p9, %p5457_p8 }
  0x1a   :  { %5465 = shalt.err (!%p5462_p10)
}
  0x1b   :  { %s5466_s16 = scalar_lea.vmem %s52_s8, 8192  ;;  %p5471_p12 = scmp.lt.s32.totalorder %s52_s8, %s52_s8 }
  0x1c   :  { %p5467_p11 = scmp.ne.s32.totalorder %s52_s8, %s5466_s16  ;;  %p5472_p13 = scmp.lt.s32.totalorder %s5466_s16, %s5466_s16 }
  0x1e   :  { %p5473_p0 = por %p5472_p13, %p5471_p12 }
  0x20   :  { %p5474_p1 = pnand %p5473_p0, %p5467_p11 }
  0x22   :  { %5477 = shalt.err (!%p5474_p1)
}
  0x23   :  { %s5578_s1 = smov 64   ;;  %s5579_s17 = smov 4  }
  0x24   :  { %57 = dma.hbm_to_vmem [thread:$0]  %s5797_s3, 8192, %s52_s8, [#allocation9], %s5578_s1, %s5578_s1, %s5579_s17  }
  0x25   :  { %s5580_s20 = smov [#allocation2]   ;;  %s5581_s22 = smov [#allocation7]  }
  0x26   :  { %s20_s21 = sshll.u32 %s5580_s20, 4  ;;  %s42_s23 = sshll.u32 %s5581_s22, 4  ;;  %s21_s21 = int_to_ptr.vmem [resolvable:$true] %s20_s21  ;;  %s43_s23 = int_to_ptr.vmem [resolvable:$true] %s42_s23 }
  0x27   :  { %s5478_s26 = scalar_lea.hbm %s5794_s0, 128 }
  0x28   :  { %p5479_p2 = scmp.ne.s32.totalorder %s5794_s0, %s5478_s26  ;;  %p5482_p3 = scmp.lt.u32.totalorder %s5478_s26, %s5794_s0 }
  0x2a   :  { %p5484_p4 = pnand %p5482_p3, %p5479_p2 }
  0x2c   :  { %5487 = shalt.err (!%p5484_p4)
}
  0x2d   :  { %s5488_s3 = scalar_lea.vmem %s21_s21, 128  ;;  %p5493_p6 = scmp.lt.s32.totalorder %s21_s21, %s21_s21 }
  0x2e   :  { %p5489_p5 = scmp.ne.s32.totalorder %s21_s21, %s5488_s3  ;;  %p5494_p7 = scmp.lt.s32.totalorder %s5488_s3, %s5488_s3 }
  0x30   :  { %p5495_p8 = por %p5494_p7, %p5493_p6 }
  0x32   :  { %p5496_p9 = pnand %p5495_p8, %p5489_p5 }
  0x34   :  { %5499 = shalt.err (!%p5496_p9)
}
  0x35   :  { %23 = dma.hbm_to_vmem [thread:$0]  %s5794_s0, 128, %s21_s21, [#allocation3]  }
  0x36   :  { %s5500_s10 = scalar_lea.hbm %s5796_s2, 128 }
  0x37   :  { %p5501_p10 = scmp.ne.s32.totalorder %s5796_s2, %s5500_s10  ;;  %p5504_p11 = scmp.lt.u32.totalorder %s5500_s10, %s5796_s2 }
  0x39   :  { %p5506_p12 = pnand %p5504_p11, %p5501_p10 }
  0x3b   :  { %5509 = shalt.err (!%p5506_p12)
}
  0x3c   :  { %s5510_s15 = scalar_lea.vmem %s43_s23, 128  ;;  %p5515_p0 = scmp.lt.s32.totalorder %s43_s23, %s43_s23 }
  0x3d   :  { %p5511_p13 = scmp.ne.s32.totalorder %s43_s23, %s5510_s15  ;;  %p5516_p1 = scmp.lt.s32.totalorder %s5510_s15, %s5510_s15 }
  0x3f   :  { %p5517_p2 = por %p5516_p1, %p5515_p0 }
  0x41   :  { %p5518_p3 = pnand %p5517_p2, %p5511_p13 }
  0x43   :  { %5521 = shalt.err (!%p5518_p3)
}
  0x44   :  { %45 = dma.hbm_to_vmem [thread:$0]  %s5796_s2, 128, %s43_s23, [#allocation6]  }
  0x45   :  { %s5582_s1 = smov [#allocation10]   ;;  %s5522_s20 = scalar_lea.hbm %s5798_s4, 16 }
  0x46   :  { %s64_s17 = sshll.u32 %s5582_s1, 4  ;;  %p5523_p4 = scmp.ne.s32.totalorder %s5798_s4, %s5522_s20  ;;  %s65_s17 = int_to_ptr.vmem [resolvable:$true] %s64_s17 }
  0x47   :  { %p5526_p5 = scmp.lt.u32.totalorder %s5522_s20, %s5798_s4 }
  0x49   :  { %p5528_p6 = pnand %p5526_p5, %p5523_p4 }
  0x4b   :  { %5531 = shalt.err (!%p5528_p6)
}
  0x4c   :  { %s5532_s26 = scalar_lea.vmem %s65_s17, 16  ;;  %s5536_s2 = scalar_lea.vmem %s65_s17, 32 }
  0x4d   :  { %p5533_p7 = scmp.ne.s32.totalorder %s65_s17, %s5532_s26  ;;  %p5537_p8 = scmp.lt.s32.totalorder %s65_s17, %s65_s17 }
  0x4e   :  { %p5538_p9 = scmp.lt.s32.totalorder %s5536_s2, %s5532_s26 }
  0x50   :  { %p5539_p10 = por %p5538_p9, %p5537_p8 }
  0x52   :  { %p5540_p11 = pnand %p5539_p10, %p5533_p7 }
  0x54   :  { %5543 = shalt.err (!%p5540_p11)
}
  0x55   :  { %67 = dma.hbm_to_vmem [thread:$0]  %s5798_s4, 16, %s65_s17, [#allocation9]  }
  0x56   :  { %5566 = dma.done.wait [#allocation3], 128  }
  0x57   :  { %5567 = vsyncadd [#allocation3], 4294967168 }
  0x58   :  { %5568 = dma.done.wait [#allocation6], 65664  }
  0x59   :  { %5569 = vsyncadd [#allocation6], 4294901632 }
  0x5a   :  { %5570 = dma.done.wait [#allocation9], 8208  }
  0x5b   :  { %5571 = vsyncadd [#allocation9], 4294959088  ;;  %v85_v0 = vld [vmem:[#allocation5] sm:$0xff]  ;;  %v86_v2 = vld [vmem:[#allocation5 + $0x8] sm:$0xff]  ;;  %v599_v32 = vlaneseq  ;;  %v5583_v33 = vmov 1966171168  }
  0x5c   :  { %v89_v1 = vld [vmem:[#allocation5 + $0x20] sm:$0xff]  ;;  %v90_v4 = vld [vmem:[#allocation5 + $0x28] sm:$0xff]  ;;  %v642_v34 = vunpack.c.l.s4 %v5583_v33  ;;  %v5680_v59 = vld [vmem:[#allocation2] sm:$0xff]  ;;  %s5584_s4 = smov [#allocation11]  }
  0x5d   :  { %v4633_v3 = vcombine.high %v85_v0, %v89_v1  ;;  %v4632_v5 = vcombine.low %v85_v0, %v89_v1  ;;  %v93_v6 = vld [vmem:[#allocation5 + $0x40] sm:$0xff]  ;;  %v4635_v8 = vcombine.high %v86_v2, %v90_v4  ;;  %v4634_v9 = vcombine.low %v86_v2, %v90_v4  ;;  %v94_v11 = vld [vmem:[#allocation5 + $0x48] sm:$0xff]  ;;  %s4621_s28 = sshll.u32 %s5584_s4, 4  ;;  %s4622_s28 = int_to_ptr.vmem [resolvable:$true] %s4621_s28 }
  0x5e   :  { %v97_v7 = vld [vmem:[#allocation5 + $0x60] sm:$0xff]  ;;  %v98_v12 = vld [vmem:[#allocation5 + $0x68] sm:$0xff]  ;;  %v5675_v43 = vshrl.u32 %v599_v32, 7  ;;  %v643_v44 = vunpack.c.0.s8 %v642_v34  ;;  %s5544_s29 = scalar_lea.vmem %s4622_s28, 32  ;;  %p5549_p13 = scmp.lt.s32.totalorder %s4622_s28, %s4622_s28 }
  0x5f   :  { %v4641_v10 = vcombine.high %v93_v6, %v97_v7  ;;  %v101_v13 = vld [vmem:[#allocation5 + $0x80] sm:$0xff]  ;;  %3257 = vmatprep.subr.bf16.mxu0 %v4633_v3  ;;  %v4643_v14 = vcombine.high %v94_v11, %v98_v12  ;;  %v102_v16 = vld [vmem:[#allocation5 + $0x88] sm:$0xff]  ;;  %3421 = vmatprep.subr.bf16.mxu1 %v4635_v8  ;;  %v4640_v18 = vcombine.low %v93_v6, %v97_v7  ;;  %p5545_p12 = scmp.ne.s32.totalorder %s4622_s28, %s5544_s29  ;;  %p5550_p0 = scmp.lt.s32.totalorder %s5544_s29, %s5544_s29 }
  0x60   :  { %v105_v15 = vld [vmem:[#allocation5 + $0xa0] sm:$0xff]  ;;  %v106_v17 = vld [vmem:[#allocation5 + $0xa8] sm:$0xff]  ;;  %3258 = vmatpush1.bf16.msra.mxu0 %v4632_v5  ;;  %3422 = vmatpush1.bf16.msra.mxu1 %v4634_v9  ;;  %v4642_v19 = vcombine.low %v94_v11, %v98_v12  ;;  %v5678_v53 = vsub.s32 %v643_v44, %v5675_v43 }
  0x61   :  { %3259 = vmatprep.subr.bf16.mxu0 %v4641_v10  ;;  %v4649_v20 = vcombine.high %v101_v13, %v105_v15  ;;  %3423 = vmatprep.subr.bf16.mxu1 %v4643_v14  ;;  %v4651_v21 = vcombine.high %v102_v16, %v106_v17  ;;  %v109_v22 = vld [vmem:[#allocation5 + $0xc0] sm:$0xff]  ;;  %v110_v24 = vld [vmem:[#allocation5 + $0xc8] sm:$0xff]  ;;  %v4648_v26 = vcombine.low %v101_v13, %v105_v15  ;;  %p5551_p1 = por %p5550_p0, %p5549_p13 }
  0x62   :  { %v113_v23 = vld [vmem:[#allocation5 + $0xe0] sm:$0xff]  ;;  %v114_v25 = vld [vmem:[#allocation5 + $0xe8] sm:$0xff]  ;;  %v4650_v27 = vcombine.low %v102_v16, %v106_v17  ;;  %v5684_v63 = vrot.slane %v5680_v59, %v5678_v53 }
  0x63   :  { %v4657_v28 = vcombine.high %v109_v22, %v113_v23  ;;  %v4659_v29 = vcombine.high %v110_v24, %v114_v25  ;;  %v117_v30 = vld [vmem:[#allocation5 + $0x100] sm:$0xff]  ;;  %v118_v35 = vld [vmem:[#allocation5 + $0x108] sm:$0xff]  ;;  %v4656_v37 = vcombine.low %v109_v22, %v113_v23  ;;  %v4658_v38 = vcombine.low %v110_v24, %v114_v25  ;;  %p5552_p2 = pnand %p5551_p1, %p5545_p12 }
  0x64   :  { %3260 = vmatpush1.bf16.msra.mxu0 %v4640_v18  ;;  %3424 = vmatpush1.bf16.msra.mxu1 %v4642_v19  ;;  %v121_v31 = vld [vmem:[#allocation5 + $0x120] sm:$0xff]  ;;  %v122_v36 = vld [vmem:[#allocation5 + $0x128] sm:$0xff]  ;;  %v655_v3 = vcombine.high %v5684_v63, %v5684_v63 }
  0x65   :  { %3261 = vmatprep.subr.bf16.mxu0 %v4649_v20  ;;  %3425 = vmatprep.subr.bf16.mxu1 %v4651_v21  ;;  %v4665_v39 = vcombine.high %v117_v30, %v121_v31  ;;  %v4667_v40 = vcombine.high %v118_v35, %v122_v36  ;;  %v125_v41 = vld [vmem:[#allocation5 + $0x140] sm:$0xff]  ;;  %v126_v45 = vld [vmem:[#allocation5 + $0x148] sm:$0xff]  ;;  %v4664_v47 = vcombine.low %v117_v30, %v121_v31 }
  0x66   :  { %v129_v42 = vld [vmem:[#allocation5 + $0x160] sm:$0xff]  ;;  %v130_v46 = vld [vmem:[#allocation5 + $0x168] sm:$0xff]  ;;  %v4666_v48 = vcombine.low %v118_v35, %v122_v36  ;;  %v5689_v9 = vrot.slane %v655_v3, %v5678_v53 }
  0x67   :  { %v4673_v49 = vcombine.high %v125_v41, %v129_v42  ;;  %v4675_v50 = vcombine.high %v126_v45, %v130_v46  ;;  %v133_v51 = vld [vmem:[#allocation5 + $0x180] sm:$0xff]  ;;  %v134_v54 = vld [vmem:[#allocation5 + $0x188] sm:$0xff]  ;;  %v4672_v56 = vcombine.low %v125_v41, %v129_v42  ;;  %v4674_v57 = vcombine.low %v126_v45, %v130_v46 }
  0x68   :  { %3262 = vmatpush1.bf16.msra.mxu0 %v4648_v26  ;;  %3426 = vmatpush1.bf16.msra.mxu1 %v4650_v27  ;;  %v137_v52 = vld [vmem:[#allocation5 + $0x1a0] sm:$0xff]  ;;  %v138_v55 = vld [vmem:[#allocation5 + $0x1a8] sm:$0xff] }
  0x69   :  { %3263 = vmatprep.subr.bf16.mxu0 %v4657_v28  ;;  %3427 = vmatprep.subr.bf16.mxu1 %v4659_v29  ;;  %v4681_v58 = vcombine.high %v133_v51, %v137_v52  ;;  %v4683_v60 = vcombine.high %v134_v54, %v138_v55  ;;  %v141_v61 = vld [vmem:[#allocation5 + $0x1c0] sm:$0xff]  ;;  %v142_v0 = vld [vmem:[#allocation5 + $0x1c8] sm:$0xff]  ;;  %v4680_v2 = vcombine.low %v133_v51, %v137_v52 }
  0x6a   :  { %v145_v62 = vld [vmem:[#allocation5 + $0x1e0] sm:$0xff]  ;;  %v146_v1 = vld [vmem:[#allocation5 + $0x1e8] sm:$0xff]  ;;  %v4682_v4 = vcombine.low %v134_v54, %v138_v55  ;;  %3289 = vmatprep.mubr.bf16.mxu0 %v5689_v9  ;;  %3453 = vmatprep.mubr.bf16.mxu1 %v5689_v9 }
  0x6b   :  { %v4689_v5 = vcombine.high %v141_v61, %v145_v62  ;;  %v4691_v6 = vcombine.high %v142_v0, %v146_v1  ;;  %v149_v7 = vld [vmem:[#allocation5 + $0x200] sm:$0xff]  ;;  %v150_v10 = vld [vmem:[#allocation5 + $0x208] sm:$0xff]  ;;  %v4688_v12 = vcombine.low %v141_v61, %v145_v62  ;;  %v4690_v13 = vcombine.low %v142_v0, %v146_v1 }
  0x6c   :  { %3264 = vmatpush1.bf16.msra.mxu0 %v4656_v37  ;;  %3428 = vmatpush1.bf16.msra.mxu1 %v4658_v38  ;;  %v153_v8 = vld [vmem:[#allocation5 + $0x220] sm:$0xff]  ;;  %v154_v11 = vld [vmem:[#allocation5 + $0x228] sm:$0xff] }
  0x6d   :  { %3265 = vmatprep.subr.bf16.mxu0 %v4665_v39  ;;  %3429 = vmatprep.subr.bf16.mxu1 %v4667_v40  ;;  %v4697_v14 = vcombine.high %v149_v7, %v153_v8  ;;  %v4699_v15 = vcombine.high %v150_v10, %v154_v11  ;;  %v157_v16 = vld [vmem:[#allocation5 + $0x240] sm:$0xff]  ;;  %v158_v18 = vld [vmem:[#allocation5 + $0x248] sm:$0xff]  ;;  %v4696_v20 = vcombine.low %v149_v7, %v153_v8 }
  0x6e   :  { %v161_v17 = vld [vmem:[#allocation5 + $0x260] sm:$0xff]  ;;  %v162_v19 = vld [vmem:[#allocation5 + $0x268] sm:$0xff]  ;;  %v4698_v21 = vcombine.low %v150_v10, %v154_v11 }
  0x6f   :  { %v4705_v22 = vcombine.high %v157_v16, %v161_v17  ;;  %v4707_v23 = vcombine.high %v158_v18, %v162_v19  ;;  %v165_v24 = vld [vmem:[#allocation5 + $0x280] sm:$0xff]  ;;  %v166_v26 = vld [vmem:[#allocation5 + $0x288] sm:$0xff]  ;;  %v4704_v28 = vcombine.low %v157_v16, %v161_v17  ;;  %v4706_v29 = vcombine.low %v158_v18, %v162_v19 }
  0x70   :  { %3266 = vmatpush1.bf16.msra.mxu0 %v4664_v47  ;;  %3430 = vmatpush1.bf16.msra.mxu1 %v4666_v48  ;;  %v169_v25 = vld [vmem:[#allocation5 + $0x2a0] sm:$0xff]  ;;  %v170_v27 = vld [vmem:[#allocation5 + $0x2a8] sm:$0xff]  ;;  %v640_v18 = vcombine.high %v5680_v59, %v5680_v59 }
  0x71   :  { %3267 = vmatprep.subr.bf16.mxu0 %v4673_v49  ;;  %3431 = vmatprep.subr.bf16.mxu1 %v4675_v50  ;;  %v4713_v30 = vcombine.high %v165_v24, %v169_v25  ;;  %v4715_v31 = vcombine.high %v166_v26, %v170_v27  ;;  %v173_v32 = vld [vmem:[#allocation5 + $0x2c0] sm:$0xff]  ;;  %v174_v34 = vld [vmem:[#allocation5 + $0x2c8] sm:$0xff]  ;;  %v4712_v36 = vcombine.low %v165_v24, %v169_v25 }
  0x72   :  { %v177_v33 = vld [vmem:[#allocation5 + $0x2e0] sm:$0xff]  ;;  %v178_v35 = vld [vmem:[#allocation5 + $0x2e8] sm:$0xff]  ;;  %v4714_v37 = vcombine.low %v166_v26, %v170_v27  ;;  %v654_v24 = vrot.slane %v640_v18, %v5678_v53  ;;  %v5698_v25 = vrot.slane %v5684_v63, %v5678_v53 }
  0x73   :  { %v4721_v38 = vcombine.high %v173_v32, %v177_v33  ;;  %v4723_v39 = vcombine.high %v174_v34, %v178_v35  ;;  %v181_v40 = vld [vmem:[#allocation5 + $0x300] sm:$0xff]  ;;  %v182_v42 = vld [vmem:[#allocation5 + $0x308] sm:$0xff]  ;;  %v4720_v45 = vcombine.low %v173_v32, %v177_v33  ;;  %v4722_v46 = vcombine.low %v174_v34, %v178_v35 }
  0x74   :  { %3268 = vmatpush1.bf16.msra.mxu0 %v4672_v56  ;;  %3432 = vmatpush1.bf16.msra.mxu1 %v4674_v57  ;;  %v185_v41 = vld [vmem:[#allocation5 + $0x320] sm:$0xff]  ;;  %v186_v44 = vld [vmem:[#allocation5 + $0x328] sm:$0xff] }
  0x75   :  { %3269 = vmatprep.subr.bf16.mxu0 %v4681_v58  ;;  %3433 = vmatprep.subr.bf16.mxu1 %v4683_v60  ;;  %v4729_v47 = vcombine.high %v181_v40, %v185_v41  ;;  %v4731_v48 = vcombine.high %v182_v42, %v186_v44  ;;  %v189_v49 = vld [vmem:[#allocation5 + $0x340] sm:$0xff]  ;;  %v190_v51 = vld [vmem:[#allocation5 + $0x348] sm:$0xff]  ;;  %v4728_v54 = vcombine.low %v181_v40, %v185_v41 }
  0x76   :  { %v193_v50 = vld [vmem:[#allocation5 + $0x360] sm:$0xff]  ;;  %v194_v52 = vld [vmem:[#allocation5 + $0x368] sm:$0xff]  ;;  %v4730_v55 = vcombine.low %v182_v42, %v186_v44 }
  0x77   :  { %v4737_v56 = vcombine.high %v189_v49, %v193_v50  ;;  %v4739_v57 = vcombine.high %v190_v51, %v194_v52  ;;  %v197_v58 = vld [vmem:[#allocation5 + $0x380] sm:$0xff]  ;;  %v198_v61 = vld [vmem:[#allocation5 + $0x388] sm:$0xff]  ;;  %v4736_v0 = vcombine.low %v189_v49, %v193_v50  ;;  %v4738_v1 = vcombine.low %v190_v51, %v194_v52 }
  0x78   :  { %3270 = vmatpush1.bf16.msra.mxu0 %v4680_v2  ;;  %3434 = vmatpush1.bf16.msra.mxu1 %v4682_v4  ;;  %v201_v60 = vld [vmem:[#allocation5 + $0x3a0] sm:$0xff]  ;;  %v202_v62 = vld [vmem:[#allocation5 + $0x3a8] sm:$0xff] }
  0x79   :  { %3271 = vmatprep.subr.bf16.mxu0 %v4689_v5  ;;  %3435 = vmatprep.subr.bf16.mxu1 %v4691_v6  ;;  %v4745_v2 = vcombine.high %v197_v58, %v201_v60  ;;  %v4747_v3 = vcombine.high %v198_v61, %v202_v62  ;;  %v205_v4 = vld [vmem:[#allocation5 + $0x3c0] sm:$0xff]  ;;  %v206_v6 = vld [vmem:[#allocation5 + $0x3c8] sm:$0xff]  ;;  %v4744_v8 = vcombine.low %v197_v58, %v201_v60 }
  0x7a   :  { %v209_v5 = vld [vmem:[#allocation5 + $0x3e0] sm:$0xff]  ;;  %v210_v7 = vld [vmem:[#allocation5 + $0x3e8] sm:$0xff]  ;;  %v4746_v10 = vcombine.low %v198_v61, %v202_v62 }
  0x7b   :  { %v4753_v11 = vcombine.high %v205_v4, %v209_v5  ;;  %v218_v16 = vld [vmem:[#allocation5 + $0x428] sm:$0xff]  ;;  %v4752_v17 = vcombine.low %v205_v4, %v209_v5  ;;  %v4754_v19 = vcombine.low %v206_v6, %v210_v7  ;;  %v233_v32 = vld [vmem:[#allocation5 + $0x4a0] sm:$0xff] }
  0x7c   :  { %3272 = vmatpush1.bf16.msra.mxu0 %v4688_v12  ;;  %3436 = vmatpush1.bf16.msra.mxu1 %v4690_v13  ;;  %v4755_v12 = vcombine.high %v206_v6, %v210_v7  ;;  %v213_v13 = vld [vmem:[#allocation5 + $0x400] sm:$0xff]  ;;  %v222_v26 = vld [vmem:[#allocation5 + $0x448] sm:$0xff] }
  0x7d   :  { %3273 = vmatprep.subr.bf16.mxu0 %v4697_v14  ;;  %3437 = vmatprep.subr.bf16.mxu1 %v4699_v15  ;;  %v217_v14 = vld [vmem:[#allocation5 + $0x420] sm:$0xff]  ;;  %v214_v15 = vld [vmem:[#allocation5 + $0x408] sm:$0xff] }
  0x7e   :  { %v226_v27 = vld [vmem:[#allocation5 + $0x468] sm:$0xff]  ;;  %v4762_v59 = vcombine.low %v214_v15, %v218_v16  ;;  %v237_v41 = vld [vmem:[#allocation5 + $0x4c0] sm:$0xff] }
  0x7f   :  { %v230_v33 = vld [vmem:[#allocation5 + $0x488] sm:$0xff]  ;;  %v4771_v34 = vcombine.high %v222_v26, %v226_v27  ;;  %v241_v42 = vld [vmem:[#allocation5 + $0x4e0] sm:$0xff] }
  0x80   :  { %3274 = vmatpush1.bf16.msra.mxu0 %v4696_v20  ;;  %3438 = vmatpush1.bf16.msra.mxu1 %v4698_v21  ;;  %v4761_v20 = vcombine.high %v213_v13, %v217_v14  ;;  %v4763_v21 = vcombine.high %v214_v15, %v218_v16  ;;  %v234_v35 = vld [vmem:[#allocation5 + $0x4a8] sm:$0xff]  ;;  %v245_v49 = vld [vmem:[#allocation5 + $0x500] sm:$0xff] }
  0x81   :  { %3275 = vmatprep.subr.bf16.mxu0 %v4705_v22  ;;  %3439 = vmatprep.subr.bf16.mxu1 %v4707_v23  ;;  %v221_v22 = vld [vmem:[#allocation5 + $0x440] sm:$0xff]  ;;  %v238_v44 = vld [vmem:[#allocation5 + $0x4c8] sm:$0xff] }
  0x82   :  { %v225_v23 = vld [vmem:[#allocation5 + $0x460] sm:$0xff]  ;;  %v246_v51 = vld [vmem:[#allocation5 + $0x508] sm:$0xff] }
  0x83   :  { %v249_v50 = vld [vmem:[#allocation5 + $0x520] sm:$0xff]  ;;  %v254_v61 = vld [vmem:[#allocation5 + $0x548] sm:$0xff] }
  0x84   :  { %3276 = vmatpush1.bf16.msra.mxu0 %v4704_v28  ;;  %3440 = vmatpush1.bf16.msra.mxu1 %v4706_v29  ;;  %v4760_v28 = vcombine.low %v213_v13, %v217_v14  ;;  %v656_v29 = vcombine.high %v654_v24, %v654_v24  ;;  %v253_v58 = vld [vmem:[#allocation5 + $0x540] sm:$0xff]  ;;  %v262_v6 = vld [vmem:[#allocation5 + $0x588] sm:$0xff] }
  0x85   :  { %3277 = vmatprep.subr.bf16.mxu0 %v4713_v30  ;;  %3441 = vmatprep.subr.bf16.mxu1 %v4715_v31  ;;  %v4769_v30 = vcombine.high %v221_v22, %v225_v23  ;;  %v229_v31 = vld [vmem:[#allocation5 + $0x480] sm:$0xff]  ;;  %v270_v15 = vld [vmem:[#allocation5 + $0x5c8] sm:$0xff] }
  0x86   :  { %v5705_v63 = vrot.slane %v656_v29, %v5678_v53  ;;  %v4777_v40 = vcombine.high %v229_v31, %v233_v32  ;;  %v257_v60 = vld [vmem:[#allocation5 + $0x560] sm:$0xff] }
  0x87   :  { %v261_v4 = vld [vmem:[#allocation5 + $0x580] sm:$0xff] }
  0x88   :  { %3278 = vmatpush1.bf16.msra.mxu0 %v4712_v36  ;;  %3442 = vmatpush1.bf16.msra.mxu1 %v4714_v37  ;;  %v5702_v36 = vcombine.high %v5689_v9, %v5689_v9  ;;  %v5708_v37 = vrot.slane %v654_v24, %v5678_v53  ;;  %v4776_v53 = vcombine.low %v229_v31, %v233_v32  ;;  %v265_v5 = vld [vmem:[#allocation5 + $0x5a0] sm:$0xff]  ;;  %v286_v31 = vld [vmem:[#allocation5 + $0x648] sm:$0xff] }
  0x89   :  { %3279 = vmatprep.subr.bf16.mxu0 %v4721_v38  ;;  %3443 = vmatprep.subr.bf16.mxu1 %v4723_v39  ;;  %v4768_v38 = vcombine.low %v221_v22, %v225_v23  ;;  %v4770_v39 = vcombine.low %v222_v26, %v226_v27  ;;  %v269_v13 = vld [vmem:[#allocation5 + $0x5c0] sm:$0xff]  ;;  %v4808_v18 = vcombine.low %v261_v4, %v265_v5  ;;  %v278_v23 = vld [vmem:[#allocation5 + $0x608] sm:$0xff] }
  0x8a   :  { %v273_v14 = vld [vmem:[#allocation5 + $0x5e0] sm:$0xff]  ;;  %v282_v26 = vld [vmem:[#allocation5 + $0x628] sm:$0xff] }
  0x8b   :  { %v281_v22 = vld [vmem:[#allocation5 + $0x620] sm:$0xff]  ;;  %v4816_v27 = vcombine.low %v269_v13, %v273_v14  ;;  %v4827_v32 = vcombine.high %v278_v23, %v282_v26 }
  0x8c   :  { %3280 = vmatpush1.bf16.msra.mxu0 %v4720_v45  ;;  %3444 = vmatpush1.bf16.msra.mxu1 %v4722_v46  ;;  %v4779_v45 = vcombine.high %v230_v33, %v234_v35  ;;  %v242_v46 = vld [vmem:[#allocation5 + $0x4e8] sm:$0xff] }
  0x8d   :  { %3281 = vmatprep.subr.bf16.mxu0 %v4729_v47  ;;  %3445 = vmatprep.subr.bf16.mxu1 %v4731_v48  ;;  %v4778_v47 = vcombine.low %v230_v33, %v234_v35  ;;  %v4785_v48 = vcombine.high %v237_v41, %v241_v42  ;;  %v4787_v52 = vcombine.high %v238_v44, %v242_v46  ;;  %v290_v33 = vld [vmem:[#allocation5 + $0x668] sm:$0xff] }
  0x8e   :  { %v4826_v35 = vcombine.low %v278_v23, %v282_v26  ;;  %v338_v23 = vld [vmem:[#allocation5 + $0x7e8] sm:$0xff] }
  0x90   :  { %3282 = vmatpush1.bf16.msra.mxu0 %v4728_v54  ;;  %3446 = vmatpush1.bf16.msra.mxu1 %v4730_v55  ;;  %v250_v54 = vld [vmem:[#allocation5 + $0x528] sm:$0xff]  ;;  %v4784_v55 = vcombine.low %v237_v41, %v241_v42  ;;  %v4835_v42 = vcombine.high %v286_v31, %v290_v33 }
  0x91   :  { %3283 = vmatprep.subr.bf16.mxu0 %v4737_v56  ;;  %3447 = vmatprep.subr.bf16.mxu1 %v4739_v57  ;;  %v4786_v56 = vcombine.low %v238_v44, %v242_v46  ;;  %v4793_v57 = vcombine.high %v245_v49, %v249_v50  ;;  %v4795_v62 = vcombine.high %v246_v51, %v250_v54  ;;  %v294_v41 = vld [vmem:[#allocation5 + $0x688] sm:$0xff] }
  0x92   :  { %v298_v44 = vld [vmem:[#allocation5 + $0x6a8] sm:$0xff]  ;;  %v4834_v46 = vcombine.low %v286_v31, %v290_v33 }
  0x93   :  { %v346_v31 = vld [vmem:[#allocation5 + $0x828] sm:$0xff] }
  0x94   :  { %3284 = vmatpush1.bf16.msra.mxu0 %v4736_v0  ;;  %3448 = vmatpush1.bf16.msra.mxu1 %v4738_v1  ;;  %v258_v0 = vld [vmem:[#allocation5 + $0x568] sm:$0xff]  ;;  %v4792_v1 = vcombine.low %v245_v49, %v249_v50  ;;  %v4843_v50 = vcombine.high %v294_v41, %v298_v44 }
  0x95   :  { %3285 = vmatprep.subr.bf16.mxu0 %v4745_v2  ;;  %3449 = vmatprep.subr.bf16.mxu1 %v4747_v3  ;;  %v4794_v2 = vcombine.low %v246_v51, %v250_v54  ;;  %v4801_v3 = vcombine.high %v253_v58, %v257_v60  ;;  %v4803_v7 = vcombine.high %v254_v61, %v258_v0  ;;  %v302_v49 = vld [vmem:[#allocation5 + $0x6c8] sm:$0xff] }
  0x96   :  { %v306_v51 = vld [vmem:[#allocation5 + $0x6e8] sm:$0xff]  ;;  %v4842_v54 = vcombine.low %v294_v41, %v298_v44 }
  0x97   :  { %v354_v41 = vld [vmem:[#allocation5 + $0x868] sm:$0xff] }
  0x98   :  { %3286 = vmatpush1.bf16.msra.mxu0 %v4744_v8  ;;  %3450 = vmatpush1.bf16.msra.mxu1 %v4746_v10  ;;  %v266_v8 = vld [vmem:[#allocation5 + $0x5a8] sm:$0xff]  ;;  %v4800_v10 = vcombine.low %v253_v58, %v257_v60  ;;  %v4851_v60 = vcombine.high %v302_v49, %v306_v51 }
  0x99   :  { %3287 = vmatprep.subr.bf16.mxu0 %v4753_v11  ;;  %3451 = vmatprep.subr.bf16.mxu1 %v4755_v12  ;;  %v4802_v11 = vcombine.low %v254_v61, %v258_v0  ;;  %v4809_v12 = vcombine.high %v261_v4, %v265_v5  ;;  %v4811_v16 = vcombine.high %v262_v6, %v266_v8  ;;  %v310_v58 = vld [vmem:[#allocation5 + $0x708] sm:$0xff] }
  0x9a   :  { %v314_v61 = vld [vmem:[#allocation5 + $0x728] sm:$0xff]  ;;  %v4850_v0 = vcombine.low %v302_v49, %v306_v51 }
  0x9b   :  { %v318_v4 = vld [vmem:[#allocation5 + $0x748] sm:$0xff]  ;;  %v4859_v5 = vcombine.high %v310_v58, %v314_v61 }
  0x9c   :  { %3288 = vmatpush1.bf16.msra.mxu0 %v4752_v17  ;;  %3452 = vmatpush1.bf16.msra.mxu1 %v4754_v19  ;;  %v274_v17 = vld [vmem:[#allocation5 + $0x5e8] sm:$0xff]  ;;  %v4810_v19 = vcombine.low %v262_v6, %v266_v8  ;;  %v4858_v8 = vcombine.low %v310_v58, %v314_v61 }
  0x9d   :  { %3298 = vmatprep.subr.bf16.mxu0 %v4761_v20  ;;  %3462 = vmatprep.subr.bf16.mxu1 %v4763_v21  ;;  %v4817_v20 = vcombine.high %v269_v13, %v273_v14  ;;  %v277_v21 = vld [vmem:[#allocation5 + $0x600] sm:$0xff]  ;;  %v4819_v24 = vcombine.high %v270_v15, %v274_v17  ;;  %v322_v6 = vld [vmem:[#allocation5 + $0x768] sm:$0xff] }
  0x9e   :  { %v4825_v29 = vcombine.high %v277_v21, %v281_v22  ;;  %v326_v13 = vld [vmem:[#allocation5 + $0x788] sm:$0xff]  ;;  %v4867_v14 = vcombine.high %v318_v4, %v322_v6 }
  0x9f   :  { %3290 = vmatmul.mubr.bf16.vlgmr.msra.gmra.mrb[0].mxu0 %v5698_v25  ;;  %3454 = vmatmul.mubr.bf16.vlgmr.msra.gmra.mrb[0].mxu1 %v5698_v25  ;;  %v358_v49 = vld [vmem:[#allocation5 + $0x888] sm:$0xff] }
  0xa0   :  { %3299 = vmatpush1.bf16.msra.mxu0 %v4760_v28  ;;  %3463 = vmatpush1.bf16.msra.mxu1 %v4762_v59  ;;  %v4818_v28 = vcombine.low %v270_v15, %v274_v17  ;;  %v285_v59 = vld [vmem:[#allocation5 + $0x640] sm:$0xff]  ;;  %v330_v15 = vld [vmem:[#allocation5 + $0x7a8] sm:$0xff]  ;;  %v4866_v17 = vcombine.low %v318_v4, %v322_v6 }
  0xa1   :  { %3300 = vmatprep.subr.bf16.mxu0 %v4769_v30  ;;  %3464 = vmatprep.subr.bf16.mxu1 %v4771_v34  ;;  %v289_v30 = vld [vmem:[#allocation5 + $0x660] sm:$0xff]  ;;  %v4824_v34 = vcombine.low %v277_v21, %v281_v22  ;;  %v334_v21 = vld [vmem:[#allocation5 + $0x7c8] sm:$0xff]  ;;  %v4875_v22 = vcombine.high %v326_v13, %v330_v15  ;;  %v4874_v26 = vcombine.low %v326_v13, %v330_v15 }
  0xa2   :  { %3330 = vmatprep.mubr.bf16.mxu0 %v5702_v36  ;;  %3494 = vmatprep.mubr.bf16.mxu1 %v5702_v36  ;;  %v4882_v33 = vcombine.low %v334_v21, %v338_v23  ;;  %v366_v58 = vld [vmem:[#allocation5 + $0x8c8] sm:$0xff] }
  0xa3   :  { %v374_v4 = vld [vmem:[#allocation5 + $0x908] sm:$0xff] }
  0xa4   :  { %3301 = vmatpush1.bf16.msra.mxu0 %v4768_v38  ;;  %3465 = vmatpush1.bf16.msra.mxu1 %v4770_v39  ;;  %v4833_v38 = vcombine.high %v285_v59, %v289_v30  ;;  %v293_v39 = vld [vmem:[#allocation5 + $0x680] sm:$0xff]  ;;  %v382_v13 = vld [vmem:[#allocation5 + $0x948] sm:$0xff] }
  0xa5   :  { %3302 = vmatprep.subr.bf16.mxu0 %v4777_v40  ;;  %3466 = vmatprep.subr.bf16.mxu1 %v4779_v45  ;;  %v297_v40 = vld [vmem:[#allocation5 + $0x6a0] sm:$0xff]  ;;  %v4832_v45 = vcombine.low %v285_v59, %v289_v30  ;;  %v342_v59 = vld [vmem:[#allocation5 + $0x808] sm:$0xff]  ;;  %v4883_v30 = vcombine.high %v334_v21, %v338_v23 }
  0xa6   :  { %v390_v21 = vld [vmem:[#allocation5 + $0x988] sm:$0xff] }
  0xa8   :  { %3303 = vmatpush1.bf16.msra.mxu0 %v4776_v53  ;;  %3467 = vmatpush1.bf16.msra.mxu1 %v4778_v47  ;;  %v4841_v53 = vcombine.high %v293_v39, %v297_v40  ;;  %v301_v47 = vld [vmem:[#allocation5 + $0x6c0] sm:$0xff] }
  0xa9   :  { %3304 = vmatprep.subr.bf16.mxu0 %v4785_v48  ;;  %3468 = vmatprep.subr.bf16.mxu1 %v4787_v52  ;;  %v305_v48 = vld [vmem:[#allocation5 + $0x6e0] sm:$0xff]  ;;  %v4840_v52 = vcombine.low %v293_v39, %v297_v40  ;;  %v350_v39 = vld [vmem:[#allocation5 + $0x848] sm:$0xff]  ;;  %v4891_v40 = vcombine.high %v342_v59, %v346_v31 }
  0xac   :  { %3305 = vmatpush1.bf16.msra.mxu0 %v4784_v55  ;;  %3469 = vmatpush1.bf16.msra.mxu1 %v4786_v56  ;;  %v4849_v55 = vcombine.high %v301_v47, %v305_v48  ;;  %v309_v56 = vld [vmem:[#allocation5 + $0x700] sm:$0xff] }
  0xad   :  { %3306 = vmatprep.subr.bf16.mxu0 %v4793_v57  ;;  %3470 = vmatprep.subr.bf16.mxu1 %v4795_v62  ;;  %v313_v57 = vld [vmem:[#allocation5 + $0x720] sm:$0xff]  ;;  %v4848_v62 = vcombine.low %v301_v47, %v305_v48 }
  0xae   :  { %v357_v47 = vld [vmem:[#allocation5 + $0x880] sm:$0xff] }
  0xaf   :  { %v361_v48 = vld [vmem:[#allocation5 + $0x8a0] sm:$0xff] }
  0xb0   :  { %3307 = vmatpush1.bf16.msra.mxu0 %v4792_v1  ;;  %3471 = vmatpush1.bf16.msra.mxu1 %v4794_v2  ;;  %v4857_v1 = vcombine.high %v309_v56, %v313_v57  ;;  %v317_v2 = vld [vmem:[#allocation5 + $0x740] sm:$0xff]  ;;  %v4904_v61 = vcombine.low %v357_v47, %v361_v48 }
  0xb1   :  { %3308 = vmatprep.subr.bf16.mxu0 %v4801_v3  ;;  %3472 = vmatprep.subr.bf16.mxu1 %v4803_v7  ;;  %v321_v3 = vld [vmem:[#allocation5 + $0x760] sm:$0xff]  ;;  %v4856_v7 = vcombine.low %v309_v56, %v313_v57 }
  0xb2   :  { %v365_v56 = vld [vmem:[#allocation5 + $0x8c0] sm:$0xff] }
  0xb3   :  { %v369_v57 = vld [vmem:[#allocation5 + $0x8e0] sm:$0xff] }
  0xb4   :  { %3309 = vmatpush1.bf16.msra.mxu0 %v4800_v10  ;;  %3473 = vmatpush1.bf16.msra.mxu1 %v4802_v11  ;;  %v4865_v10 = vcombine.high %v317_v2, %v321_v3  ;;  %v325_v11 = vld [vmem:[#allocation5 + $0x780] sm:$0xff]  ;;  %v4912_v6 = vcombine.low %v365_v56, %v369_v57 }
  0xb5   :  { %3310 = vmatprep.subr.bf16.mxu0 %v4809_v12  ;;  %3474 = vmatprep.subr.bf16.mxu1 %v4811_v16  ;;  %v329_v12 = vld [vmem:[#allocation5 + $0x7a0] sm:$0xff]  ;;  %v4864_v16 = vcombine.low %v317_v2, %v321_v3 }
  0xb6   :  { %v373_v2 = vld [vmem:[#allocation5 + $0x900] sm:$0xff] }
  0xb7   :  { %v377_v3 = vld [vmem:[#allocation5 + $0x920] sm:$0xff] }
  0xb8   :  { %3311 = vmatpush1.bf16.msra.mxu0 %v4808_v18  ;;  %3475 = vmatpush1.bf16.msra.mxu1 %v4810_v19  ;;  %v4873_v18 = vcombine.high %v325_v11, %v329_v12  ;;  %v333_v19 = vld [vmem:[#allocation5 + $0x7c0] sm:$0xff]  ;;  %v4920_v15 = vcombine.low %v373_v2, %v377_v3 }
  0xb9   :  { %3312 = vmatprep.subr.bf16.mxu0 %v4817_v20  ;;  %3476 = vmatprep.subr.bf16.mxu1 %v4819_v24  ;;  %v337_v20 = vld [vmem:[#allocation5 + $0x7e0] sm:$0xff]  ;;  %v4872_v24 = vcombine.low %v325_v11, %v329_v12 }
  0xba   :  { %v381_v11 = vld [vmem:[#allocation5 + $0x940] sm:$0xff] }
  0xbb   :  { %v385_v12 = vld [vmem:[#allocation5 + $0x960] sm:$0xff] }
  0xbc   :  { %3313 = vmatpush1.bf16.msra.mxu0 %v4816_v27  ;;  %3477 = vmatpush1.bf16.msra.mxu1 %v4818_v28  ;;  %v4881_v27 = vcombine.high %v333_v19, %v337_v20  ;;  %v341_v28 = vld [vmem:[#allocation5 + $0x800] sm:$0xff]  ;;  %v4928_v23 = vcombine.low %v381_v11, %v385_v12 }
  0xbd   :  { %3314 = vmatprep.subr.bf16.mxu0 %v4825_v29  ;;  %3478 = vmatprep.subr.bf16.mxu1 %v4827_v32  ;;  %v345_v29 = vld [vmem:[#allocation5 + $0x820] sm:$0xff]  ;;  %v4880_v32 = vcombine.low %v333_v19, %v337_v20 }
  0xbe   :  { %v4888_v44 = vcombine.low %v341_v28, %v345_v29  ;;  %v389_v19 = vld [vmem:[#allocation5 + $0x980] sm:$0xff] }
  0xbf   :  { %v393_v20 = vld [vmem:[#allocation5 + $0x9a0] sm:$0xff] }
  0xc0   :  { %3315 = vmatpush1.bf16.msra.mxu0 %v4824_v34  ;;  %3479 = vmatpush1.bf16.msra.mxu1 %v4826_v35  ;;  %v4889_v34 = vcombine.high %v341_v28, %v345_v29  ;;  %v349_v35 = vld [vmem:[#allocation5 + $0x840] sm:$0xff] }
  0xc1   :  { %3316 = vmatprep.subr.bf16.mxu0 %v4833_v38  ;;  %3480 = vmatprep.subr.bf16.mxu1 %v4835_v42  ;;  %v353_v38 = vld [vmem:[#allocation5 + $0x860] sm:$0xff]  ;;  %v5716_v42 = vcombine.high %v5698_v25, %v5698_v25 }
  0xc2   :  { %v4896_v51 = vcombine.low %v349_v35, %v353_v38  ;;  %v397_v28 = vld [vmem:[#allocation5 + $0x9c0] sm:$0xff] }
  0xc3   :  { %v401_v29 = vld [vmem:[#allocation5 + $0x9e0] sm:$0xff] }
  0xc4   :  { %3317 = vmatpush1.bf16.msra.mxu0 %v4832_v45  ;;  %3481 = vmatpush1.bf16.msra.mxu1 %v4834_v46  ;;  %v4890_v45 = vcombine.low %v342_v59, %v346_v31  ;;  %v4897_v46 = vcombine.high %v349_v35, %v353_v38  ;;  %v398_v59 = vld [vmem:[#allocation5 + $0x9c8] sm:$0xff]  ;;  %v4936_v31 = vcombine.low %v389_v19, %v393_v20  ;;  %v405_v35 = vld [vmem:[#allocation5 + $0xa00] sm:$0xff] }
  0xc5   :  { %3318 = vmatprep.subr.bf16.mxu0 %v4841_v53  ;;  %3482 = vmatprep.subr.bf16.mxu1 %v4843_v50  ;;  %v4899_v53 = vcombine.high %v350_v39, %v354_v41  ;;  %v362_v50 = vld [vmem:[#allocation5 + $0x8a8] sm:$0xff]  ;;  %v409_v38 = vld [vmem:[#allocation5 + $0xa20] sm:$0xff] }
  0xc8   :  { %3319 = vmatpush1.bf16.msra.mxu0 %v4840_v52  ;;  %3483 = vmatpush1.bf16.msra.mxu1 %v4842_v54  ;;  %v4898_v52 = vcombine.low %v350_v39, %v354_v41  ;;  %v4905_v54 = vcombine.high %v357_v47, %v361_v48  ;;  %v406_v39 = vld [vmem:[#allocation5 + $0xa08] sm:$0xff]  ;;  %v4944_v41 = vcombine.low %v397_v28, %v401_v29  ;;  %v417_v47 = vld [vmem:[#allocation5 + $0xa60] sm:$0xff] }
  0xc9   :  { %3320 = vmatprep.subr.bf16.mxu0 %v4849_v55  ;;  %3484 = vmatprep.subr.bf16.mxu1 %v4851_v60  ;;  %v4907_v55 = vcombine.high %v358_v49, %v362_v50  ;;  %v370_v60 = vld [vmem:[#allocation5 + $0x8e8] sm:$0xff] }
  0xca   :  { %v414_v48 = vld [vmem:[#allocation5 + $0xa48] sm:$0xff] }
  0xcc   :  { %3321 = vmatpush1.bf16.msra.mxu0 %v4848_v62  ;;  %3485 = vmatpush1.bf16.msra.mxu1 %v4850_v0  ;;  %v4906_v62 = vcombine.low %v358_v49, %v362_v50  ;;  %v4913_v0 = vcombine.high %v365_v56, %v369_v57  ;;  %v418_v49 = vld [vmem:[#allocation5 + $0xa68] sm:$0xff]  ;;  %v4952_v50 = vcombine.low %v405_v35, %v409_v38  ;;  %v425_v56 = vld [vmem:[#allocation5 + $0xaa0] sm:$0xff] }
  0xcd   :  { %3322 = vmatprep.subr.bf16.mxu0 %v4857_v1  ;;  %3486 = vmatprep.subr.bf16.mxu1 %v4859_v5  ;;  %v4915_v1 = vcombine.high %v366_v58, %v370_v60  ;;  %v378_v5 = vld [vmem:[#allocation5 + $0x928] sm:$0xff] }
  0xce   :  { %v422_v57 = vld [vmem:[#allocation5 + $0xa88] sm:$0xff] }
  0xd0   :  { %3323 = vmatpush1.bf16.msra.mxu0 %v4856_v7  ;;  %3487 = vmatpush1.bf16.msra.mxu1 %v4858_v8  ;;  %v4914_v7 = vcombine.low %v366_v58, %v370_v60  ;;  %v4921_v8 = vcombine.high %v373_v2, %v377_v3  ;;  %v426_v58 = vld [vmem:[#allocation5 + $0xaa8] sm:$0xff]  ;;  %v433_v2 = vld [vmem:[#allocation5 + $0xae0] sm:$0xff] }
  0xd1   :  { %3324 = vmatprep.subr.bf16.mxu0 %v4865_v10  ;;  %3488 = vmatprep.subr.bf16.mxu1 %v4867_v14  ;;  %v4923_v10 = vcombine.high %v374_v4, %v378_v5  ;;  %v386_v14 = vld [vmem:[#allocation5 + $0x968] sm:$0xff] }
  0xd2   :  { %v430_v3 = vld [vmem:[#allocation5 + $0xac8] sm:$0xff] }
  0xd4   :  { %3325 = vmatpush1.bf16.msra.mxu0 %v4864_v16  ;;  %3489 = vmatpush1.bf16.msra.mxu1 %v4866_v17  ;;  %v4922_v16 = vcombine.low %v374_v4, %v378_v5  ;;  %v4929_v17 = vcombine.high %v381_v11, %v385_v12  ;;  %v434_v4 = vld [vmem:[#allocation5 + $0xae8] sm:$0xff]  ;;  %v441_v11 = vld [vmem:[#allocation5 + $0xb20] sm:$0xff] }
  0xd5   :  { %3326 = vmatprep.subr.bf16.mxu0 %v4873_v18  ;;  %3490 = vmatprep.subr.bf16.mxu1 %v4875_v22  ;;  %v4931_v18 = vcombine.high %v382_v13, %v386_v14  ;;  %v394_v22 = vld [vmem:[#allocation5 + $0x9a8] sm:$0xff] }
  0xd6   :  { %v438_v12 = vld [vmem:[#allocation5 + $0xb08] sm:$0xff] }
  0xd8   :  { %3327 = vmatpush1.bf16.msra.mxu0 %v4872_v24  ;;  %3491 = vmatpush1.bf16.msra.mxu1 %v4874_v26  ;;  %v4930_v24 = vcombine.low %v382_v13, %v386_v14  ;;  %v4937_v26 = vcombine.high %v389_v19, %v393_v20  ;;  %v442_v13 = vld [vmem:[#allocation5 + $0xb28] sm:$0xff]  ;;  %v449_v19 = vld [vmem:[#allocation5 + $0xb60] sm:$0xff] }
  0xd9   :  { %3328 = vmatprep.subr.bf16.mxu0 %v4881_v27  ;;  %3492 = vmatprep.subr.bf16.mxu1 %v4883_v30  ;;  %v4939_v27 = vcombine.high %v390_v21, %v394_v22  ;;  %v402_v30 = vld [vmem:[#allocation5 + $0x9e8] sm:$0xff] }
  0xda   :  { %v446_v20 = vld [vmem:[#allocation5 + $0xb48] sm:$0xff] }
  0xdc   :  { %3329 = vmatpush1.bf16.msra.mxu0 %v4880_v32  ;;  %3493 = vmatpush1.bf16.msra.mxu1 %v4882_v33  ;;  %v4938_v32 = vcombine.low %v390_v21, %v394_v22  ;;  %v4945_v33 = vcombine.high %v397_v28, %v401_v29  ;;  %v450_v21 = vld [vmem:[#allocation5 + $0xb68] sm:$0xff]  ;;  %v457_v28 = vld [vmem:[#allocation5 + $0xba0] sm:$0xff] }
  0xdd   :  { %3339 = vmatprep.subr.bf16.mxu0 %v4889_v34  ;;  %3503 = vmatprep.subr.bf16.mxu1 %v4891_v40  ;;  %v4947_v34 = vcombine.high %v398_v59, %v402_v30  ;;  %v410_v40 = vld [vmem:[#allocation5 + $0xa28] sm:$0xff] }
  0xde   :  { %v454_v29 = vld [vmem:[#allocation5 + $0xb88] sm:$0xff] }
  0xdf   :  { %3331 = vmatmul.mubr.bf16.vlgmr.msra.gmra.mrb[0].mxu0 %v5716_v42  ;;  %3495 = vmatmul.mubr.bf16.vlgmr.msra.gmra.mrb[0].mxu1 %v5716_v42 }
  0xe0   :  { %3340 = vmatpush1.bf16.msra.mxu0 %v4888_v44  ;;  %3504 = vmatpush1.bf16.msra.mxu1 %v4890_v45  ;;  %v4946_v44 = vcombine.low %v398_v59, %v402_v30  ;;  %v4953_v45 = vcombine.high %v405_v35, %v409_v38  ;;  %v458_v59 = vld [vmem:[#allocation5 + $0xba8] sm:$0xff]  ;;  %v465_v35 = vld [vmem:[#allocation5 + $0xbe0] sm:$0xff] }
  0xe1   :  { %3341 = vmatprep.subr.bf16.mxu0 %v4897_v46  ;;  %3505 = vmatprep.subr.bf16.mxu1 %v4899_v53  ;;  %v4955_v46 = vcombine.high %v406_v39, %v410_v40  ;;  %v413_v53 = vld [vmem:[#allocation5 + $0xa40] sm:$0xff]  ;;  %v462_v38 = vld [vmem:[#allocation5 + $0xbc8] sm:$0xff] }
  0xe2   :  { %3371 = vmatprep.mubr.bf16.mxu0 %v5705_v63  ;;  %3535 = vmatprep.mubr.bf16.mxu1 %v5705_v63  ;;  %v4960_v60 = vcombine.low %v413_v53, %v417_v47 }
  0xe4   :  { %3342 = vmatpush1.bf16.msra.mxu0 %v4896_v51  ;;  %3506 = vmatpush1.bf16.msra.mxu1 %v4898_v52  ;;  %v4954_v51 = vcombine.low %v406_v39, %v410_v40  ;;  %v4961_v52 = vcombine.high %v413_v53, %v417_v47  ;;  %v466_v39 = vld [vmem:[#allocation5 + $0xbe8] sm:$0xff]  ;;  %v473_v53 = vld [vmem:[#allocation5 + $0xc20] sm:$0xff] }
  0xe5   :  { %3343 = vmatprep.subr.bf16.mxu0 %v4905_v54  ;;  %3507 = vmatprep.subr.bf16.mxu1 %v4907_v55  ;;  %v4963_v54 = vcombine.high %v414_v48, %v418_v49  ;;  %v421_v55 = vld [vmem:[#allocation5 + $0xa80] sm:$0xff]  ;;  %v470_v47 = vld [vmem:[#allocation5 + $0xc08] sm:$0xff] }
  0xe6   :  { %v4968_v5 = vcombine.low %v421_v55, %v425_v56 }
  0xe8   :  { %3344 = vmatpush1.bf16.msra.mxu0 %v4904_v61  ;;  %3508 = vmatpush1.bf16.msra.mxu1 %v4906_v62  ;;  %v4962_v61 = vcombine.low %v414_v48, %v418_v49  ;;  %v4969_v62 = vcombine.high %v421_v55, %v425_v56  ;;  %v474_v48 = vld [vmem:[#allocation5 + $0xc28] sm:$0xff]  ;;  %v481_v55 = vld [vmem:[#allocation5 + $0xc60] sm:$0xff] }
  0xe9   :  { %3345 = vmatprep.subr.bf16.mxu0 %v4913_v0  ;;  %3509 = vmatprep.subr.bf16.mxu1 %v4915_v1  ;;  %v4971_v0 = vcombine.high %v422_v57, %v426_v58  ;;  %v429_v1 = vld [vmem:[#allocation5 + $0xac0] sm:$0xff]  ;;  %v478_v56 = vld [vmem:[#allocation5 + $0xc48] sm:$0xff] }
  0xea   :  { %v4976_v14 = vcombine.low %v429_v1, %v433_v2 }
  0xec   :  { %3346 = vmatpush1.bf16.msra.mxu0 %v4912_v6  ;;  %3510 = vmatpush1.bf16.msra.mxu1 %v4914_v7  ;;  %v4970_v6 = vcombine.low %v422_v57, %v426_v58  ;;  %v4977_v7 = vcombine.high %v429_v1, %v433_v2  ;;  %v482_v57 = vld [vmem:[#allocation5 + $0xc68] sm:$0xff]  ;;  %v489_v1 = vld [vmem:[#allocation5 + $0xca0] sm:$0xff]  ;;  %v5724_v2 = vcombine.high %v5705_v63, %v5705_v63 }
  0xed   :  { %3347 = vmatprep.subr.bf16.mxu0 %v4921_v8  ;;  %3511 = vmatprep.subr.bf16.mxu1 %v4923_v10  ;;  %v4979_v8 = vcombine.high %v430_v3, %v434_v4  ;;  %v437_v10 = vld [vmem:[#allocation5 + $0xb00] sm:$0xff] }
  0xee   :  { %v4984_v22 = vcombine.low %v437_v10, %v441_v11 }
  0xf0   :  { %3348 = vmatpush1.bf16.msra.mxu0 %v4920_v15  ;;  %3512 = vmatpush1.bf16.msra.mxu1 %v4922_v16  ;;  %v4978_v15 = vcombine.low %v430_v3, %v434_v4  ;;  %v4985_v16 = vcombine.high %v437_v10, %v441_v11  ;;  %v486_v3 = vld [vmem:[#allocation5 + $0xc88] sm:$0xff]  ;;  %v493_v10 = vld [vmem:[#allocation5 + $0xcc0] sm:$0xff] }
  0xf1   :  { %3349 = vmatprep.subr.bf16.mxu0 %v4929_v17  ;;  %3513 = vmatprep.subr.bf16.mxu1 %v4931_v18  ;;  %v4987_v17 = vcombine.high %v438_v12, %v442_v13  ;;  %v445_v18 = vld [vmem:[#allocation5 + $0xb40] sm:$0xff]  ;;  %v490_v4 = vld [vmem:[#allocation5 + $0xca8] sm:$0xff] }
  0xf2   :  { %v4992_v30 = vcombine.low %v445_v18, %v449_v19  ;;  %v497_v11 = vld [vmem:[#allocation5 + $0xce0] sm:$0xff] }
  0xf4   :  { %3350 = vmatpush1.bf16.msra.mxu0 %v4928_v23  ;;  %3514 = vmatpush1.bf16.msra.mxu1 %v4930_v24  ;;  %v4986_v23 = vcombine.low %v438_v12, %v442_v13  ;;  %v4993_v24 = vcombine.high %v445_v18, %v449_v19  ;;  %v494_v12 = vld [vmem:[#allocation5 + $0xcc8] sm:$0xff]  ;;  %v501_v18 = vld [vmem:[#allocation5 + $0xd00] sm:$0xff] }
  0xf5   :  { %3351 = vmatprep.subr.bf16.mxu0 %v4937_v26  ;;  %3515 = vmatprep.subr.bf16.mxu1 %v4939_v27  ;;  %v4995_v26 = vcombine.high %v446_v20, %v450_v21  ;;  %v453_v27 = vld [vmem:[#allocation5 + $0xb80] sm:$0xff]  ;;  %v498_v13 = vld [vmem:[#allocation5 + $0xce8] sm:$0xff] }
  0xf6   :  { %v5000_v40 = vcombine.low %v453_v27, %v457_v28  ;;  %v505_v19 = vld [vmem:[#allocation5 + $0xd20] sm:$0xff] }
  0xf8   :  { %3352 = vmatpush1.bf16.msra.mxu0 %v4936_v31  ;;  %3516 = vmatpush1.bf16.msra.mxu1 %v4938_v32  ;;  %v4994_v31 = vcombine.low %v446_v20, %v450_v21  ;;  %v5001_v32 = vcombine.high %v453_v27, %v457_v28  ;;  %v502_v20 = vld [vmem:[#allocation5 + $0xd08] sm:$0xff]  ;;  %v509_v27 = vld [vmem:[#allocation5 + $0xd40] sm:$0xff] }
  0xf9   :  { %3353 = vmatprep.subr.bf16.mxu0 %v4945_v33  ;;  %3517 = vmatprep.subr.bf16.mxu1 %v4947_v34  ;;  %v5003_v33 = vcombine.high %v454_v29, %v458_v59  ;;  %v461_v34 = vld [vmem:[#allocation5 + $0xbc0] sm:$0xff]  ;;  %v506_v21 = vld [vmem:[#allocation5 + $0xd28] sm:$0xff] }
  0xfa   :  { %v5008_v49 = vcombine.low %v461_v34, %v465_v35  ;;  %v513_v28 = vld [vmem:[#allocation5 + $0xd60] sm:$0xff] }
  0xfc   :  { %3354 = vmatpush1.bf16.msra.mxu0 %v4944_v41  ;;  %3518 = vmatpush1.bf16.msra.mxu1 %v4946_v44  ;;  %v5002_v41 = vcombine.low %v454_v29, %v458_v59  ;;  %v5009_v44 = vcombine.high %v461_v34, %v465_v35  ;;  %v510_v29 = vld [vmem:[#allocation5 + $0xd48] sm:$0xff]  ;;  %v517_v34 = vld [vmem:[#allocation5 + $0xd80] sm:$0xff] }
  0xfd   :  { %3355 = vmatprep.subr.bf16.mxu0 %v4953_v45  ;;  %3519 = vmatprep.subr.bf16.mxu1 %v4955_v46  ;;  %v5011_v45 = vcombine.high %v462_v38, %v466_v39  ;;  %v469_v46 = vld [vmem:[#allocation5 + $0xc00] sm:$0xff]  ;;  %v514_v59 = vld [vmem:[#allocation5 + $0xd68] sm:$0xff] }
  0xfe   :  { %v5016_v58 = vcombine.low %v469_v46, %v473_v53  ;;  %v521_v35 = vld [vmem:[#allocation5 + $0xda0] sm:$0xff] }
 0x100   :  { %3356 = vmatpush1.bf16.msra.mxu0 %v4952_v50  ;;  %3520 = vmatpush1.bf16.msra.mxu1 %v4954_v51  ;;  %v5010_v50 = vcombine.low %v462_v38, %v466_v39  ;;  %v5017_v51 = vcombine.high %v469_v46, %v473_v53  ;;  %v518_v38 = vld [vmem:[#allocation5 + $0xd88] sm:$0xff]  ;;  %v525_v46 = vld [vmem:[#allocation5 + $0xdc0] sm:$0xff] }
 0x101   :  { %3357 = vmatprep.subr.bf16.mxu0 %v4961_v52  ;;  %3521 = vmatprep.subr.bf16.mxu1 %v4963_v54  ;;  %v5019_v52 = vcombine.high %v470_v47, %v474_v48  ;;  %v477_v54 = vld [vmem:[#allocation5 + $0xc40] sm:$0xff]  ;;  %v522_v39 = vld [vmem:[#allocation5 + $0xda8] sm:$0xff] }
 0x102   :  { %v529_v53 = vld [vmem:[#allocation5 + $0xde0] sm:$0xff] }
 0x104   :  { %3358 = vmatpush1.bf16.msra.mxu0 %v4960_v60  ;;  %3522 = vmatpush1.bf16.msra.mxu1 %v4962_v61  ;;  %v5018_v60 = vcombine.low %v470_v47, %v474_v48  ;;  %v5025_v61 = vcombine.high %v477_v54, %v481_v55  ;;  %v526_v47 = vld [vmem:[#allocation5 + $0xdc8] sm:$0xff] }
 0x105   :  { %3359 = vmatprep.subr.bf16.mxu0 %v4969_v62  ;;  %3523 = vmatprep.subr.bf16.mxu1 %v4971_v0  ;;  %v5027_v62 = vcombine.high %v478_v56, %v482_v57  ;;  %v485_v0 = vld [vmem:[#allocation5 + $0xc80] sm:$0xff]  ;;  %v530_v48 = vld [vmem:[#allocation5 + $0xde8] sm:$0xff] }
 0x108   :  { %3360 = vmatpush1.bf16.msra.mxu0 %v4968_v5  ;;  %3524 = vmatpush1.bf16.msra.mxu1 %v4970_v6  ;;  %v5024_v5 = vcombine.low %v477_v54, %v481_v55  ;;  %v5026_v6 = vcombine.low %v478_v56, %v482_v57  ;;  %v533_v54 = vld [vmem:[#allocation5 + $0xe00] sm:$0xff]  ;;  %v534_v56 = vld [vmem:[#allocation5 + $0xe08] sm:$0xff] }
 0x109   :  { %3361 = vmatprep.subr.bf16.mxu0 %v4977_v7  ;;  %3525 = vmatprep.subr.bf16.mxu1 %v4979_v8  ;;  %v5033_v7 = vcombine.high %v485_v0, %v489_v1  ;;  %v5035_v8 = vcombine.high %v486_v3, %v490_v4  ;;  %v537_v55 = vld [vmem:[#allocation5 + $0xe20] sm:$0xff]  ;;  %v538_v57 = vld [vmem:[#allocation5 + $0xe28] sm:$0xff] }
 0x10c   :  { %3362 = vmatpush1.bf16.msra.mxu0 %v4976_v14  ;;  %3526 = vmatpush1.bf16.msra.mxu1 %v4978_v15  ;;  %v5032_v14 = vcombine.low %v485_v0, %v489_v1  ;;  %v5034_v15 = vcombine.low %v486_v3, %v490_v4  ;;  %v541_v0 = vld [vmem:[#allocation5 + $0xe40] sm:$0xff]  ;;  %v542_v3 = vld [vmem:[#allocation5 + $0xe48] sm:$0xff] }
 0x10d   :  { %3363 = vmatprep.subr.bf16.mxu0 %v4985_v16  ;;  %3527 = vmatprep.subr.bf16.mxu1 %v4987_v17  ;;  %v5041_v16 = vcombine.high %v493_v10, %v497_v11  ;;  %v5043_v17 = vcombine.high %v494_v12, %v498_v13  ;;  %v545_v1 = vld [vmem:[#allocation5 + $0xe60] sm:$0xff]  ;;  %v546_v4 = vld [vmem:[#allocation5 + $0xe68] sm:$0xff] }
 0x110   :  { %3364 = vmatpush1.bf16.msra.mxu0 %v4984_v22  ;;  %3528 = vmatpush1.bf16.msra.mxu1 %v4986_v23  ;;  %v5040_v22 = vcombine.low %v493_v10, %v497_v11  ;;  %v5042_v23 = vcombine.low %v494_v12, %v498_v13  ;;  %v549_v10 = vld [vmem:[#allocation5 + $0xe80] sm:$0xff]  ;;  %v550_v12 = vld [vmem:[#allocation5 + $0xe88] sm:$0xff] }
 0x111   :  { %3365 = vmatprep.subr.bf16.mxu0 %v4993_v24  ;;  %3529 = vmatprep.subr.bf16.mxu1 %v4995_v26  ;;  %v5049_v24 = vcombine.high %v501_v18, %v505_v19  ;;  %v5051_v26 = vcombine.high %v502_v20, %v506_v21  ;;  %v553_v11 = vld [vmem:[#allocation5 + $0xea0] sm:$0xff]  ;;  %v554_v13 = vld [vmem:[#allocation5 + $0xea8] sm:$0xff] }
 0x114   :  { %3366 = vmatpush1.bf16.msra.mxu0 %v4992_v30  ;;  %3530 = vmatpush1.bf16.msra.mxu1 %v4994_v31  ;;  %v5048_v30 = vcombine.low %v501_v18, %v505_v19  ;;  %v5050_v31 = vcombine.low %v502_v20, %v506_v21  ;;  %v557_v18 = vld [vmem:[#allocation5 + $0xec0] sm:$0xff]  ;;  %v558_v20 = vld [vmem:[#allocation5 + $0xec8] sm:$0xff] }
 0x115   :  { %3367 = vmatprep.subr.bf16.mxu0 %v5001_v32  ;;  %3531 = vmatprep.subr.bf16.mxu1 %v5003_v33  ;;  %v5057_v32 = vcombine.high %v509_v27, %v513_v28  ;;  %v5059_v33 = vcombine.high %v510_v29, %v514_v59  ;;  %v561_v19 = vld [vmem:[#allocation5 + $0xee0] sm:$0xff]  ;;  %v562_v21 = vld [vmem:[#allocation5 + $0xee8] sm:$0xff] }
 0x118   :  { %3368 = vmatpush1.bf16.msra.mxu0 %v5000_v40  ;;  %3532 = vmatpush1.bf16.msra.mxu1 %v5002_v41  ;;  %v5056_v40 = vcombine.low %v509_v27, %v513_v28  ;;  %v5058_v41 = vcombine.low %v510_v29, %v514_v59  ;;  %v565_v27 = vld [vmem:[#allocation5 + $0xf00] sm:$0xff]  ;;  %v566_v29 = vld [vmem:[#allocation5 + $0xf08] sm:$0xff] }
 0x119   :  { %3369 = vmatprep.subr.bf16.mxu0 %v5009_v44  ;;  %3533 = vmatprep.subr.bf16.mxu1 %v5011_v45  ;;  %v5065_v44 = vcombine.high %v517_v34, %v521_v35  ;;  %v5067_v45 = vcombine.high %v518_v38, %v522_v39  ;;  %v569_v28 = vld [vmem:[#allocation5 + $0xf20] sm:$0xff]  ;;  %v570_v59 = vld [vmem:[#allocation5 + $0xf28] sm:$0xff] }
 0x11c   :  { %3370 = vmatpush1.bf16.msra.mxu0 %v5008_v49  ;;  %3534 = vmatpush1.bf16.msra.mxu1 %v5010_v50  ;;  %v5064_v49 = vcombine.low %v517_v34, %v521_v35  ;;  %v5066_v50 = vcombine.low %v518_v38, %v522_v39  ;;  %v573_v34 = vld [vmem:[#allocation5 + $0xf40] sm:$0xff]  ;;  %v574_v38 = vld [vmem:[#allocation5 + $0xf48] sm:$0xff] }
 0x11d   :  { %3380 = vmatprep.subr.bf16.mxu0 %v5017_v51  ;;  %3544 = vmatprep.subr.bf16.mxu1 %v5019_v52  ;;  %v5073_v51 = vcombine.high %v525_v46, %v529_v53  ;;  %v5075_v52 = vcombine.high %v526_v47, %v530_v48  ;;  %v577_v35 = vld [vmem:[#allocation5 + $0xf60] sm:$0xff]  ;;  %v578_v39 = vld [vmem:[#allocation5 + $0xf68] sm:$0xff] }
 0x11f   :  { %3372 = vmatmul.mubr.bf16.vlgmr.msra.gmra.mrb[0].mxu0 %v5708_v37  ;;  %3536 = vmatmul.mubr.bf16.vlgmr.msra.gmra.mrb[0].mxu1 %v5708_v37 }
 0x120   :  { %3381 = vmatpush1.bf16.msra.mxu0 %v5016_v58  ;;  %3545 = vmatpush1.bf16.msra.mxu1 %v5018_v60  ;;  %v5072_v58 = vcombine.low %v525_v46, %v529_v53  ;;  %v5074_v60 = vcombine.low %v526_v47, %v530_v48  ;;  %v581_v46 = vld [vmem:[#allocation5 + $0xf80] sm:$0xff]  ;;  %v582_v47 = vld [vmem:[#allocation5 + $0xf88] sm:$0xff] }
 0x121   :  { %3382 = vmatprep.subr.bf16.mxu0 %v5025_v61  ;;  %3546 = vmatprep.subr.bf16.mxu1 %v5027_v62  ;;  %v5081_v61 = vcombine.high %v533_v54, %v537_v55  ;;  %v5083_v62 = vcombine.high %v534_v56, %v538_v57  ;;  %v585_v53 = vld [vmem:[#allocation5 + $0xfa0] sm:$0xff]  ;;  %v586_v48 = vld [vmem:[#allocation5 + $0xfa8] sm:$0xff] }
 0x122   :  { %3412 = vmatprep.mubr.bf16.mxu0 %v5724_v2  ;;  %3576 = vmatprep.mubr.bf16.mxu1 %v5724_v2 }
 0x124   :  { %3383 = vmatpush1.bf16.msra.mxu0 %v5024_v5  ;;  %3547 = vmatpush1.bf16.msra.mxu1 %v5026_v6  ;;  %v5080_v5 = vcombine.low %v533_v54, %v537_v55  ;;  %v5082_v6 = vcombine.low %v534_v56, %v538_v57  ;;  %v589_v54 = vld [vmem:[#allocation5 + $0xfc0] sm:$0xff]  ;;  %v590_v56 = vld [vmem:[#allocation5 + $0xfc8] sm:$0xff] }
 0x125   :  { %3384 = vmatprep.subr.bf16.mxu0 %v5033_v7  ;;  %3548 = vmatprep.subr.bf16.mxu1 %v5035_v8  ;;  %v5089_v7 = vcombine.high %v541_v0, %v545_v1  ;;  %v5091_v8 = vcombine.high %v542_v3, %v546_v4  ;;  %v593_v55 = vld [vmem:[#allocation5 + $0xfe0] sm:$0xff]  ;;  %v594_v57 = vld [vmem:[#allocation5 + $0xfe8] sm:$0xff] }
 0x128   :  { %3385 = vmatpush1.bf16.msra.mxu0 %v5032_v14  ;;  %3549 = vmatpush1.bf16.msra.mxu1 %v5034_v15  ;;  %v5088_v14 = vcombine.low %v541_v0, %v545_v1  ;;  %v5090_v15 = vcombine.low %v542_v3, %v546_v4  ;;  %v87_v0 = vld [vmem:[#allocation5 + $0x10] sm:$0xff]  ;;  %v88_v3 = vld [vmem:[#allocation5 + $0x18] sm:$0xff] }
 0x129   :  { %3386 = vmatprep.subr.bf16.mxu0 %v5041_v16  ;;  %3550 = vmatprep.subr.bf16.mxu1 %v5043_v17  ;;  %v5097_v16 = vcombine.high %v549_v10, %v553_v11  ;;  %v5099_v17 = vcombine.high %v550_v12, %v554_v13  ;;  %v91_v1 = vld [vmem:[#allocation5 + $0x30] sm:$0xff]  ;;  %v92_v4 = vld [vmem:[#allocation5 + $0x38] sm:$0xff] }
 0x12c   :  { %3387 = vmatpush1.bf16.msra.mxu0 %v5040_v22  ;;  %3551 = vmatpush1.bf16.msra.mxu1 %v5042_v23  ;;  %v5096_v22 = vcombine.low %v549_v10, %v553_v11  ;;  %v5098_v23 = vcombine.low %v550_v12, %v554_v13  ;;  %v95_v10 = vld [vmem:[#allocation5 + $0x50] sm:$0xff]  ;;  %v5732_v12 = vcombine.high %v5708_v37, %v5708_v37  ;;  %v96_v13 = vld [vmem:[#allocation5 + $0x58] sm:$0xff] }
 0x12d   :  { %3388 = vmatprep.subr.bf16.mxu0 %v5049_v24  ;;  %3552 = vmatprep.subr.bf16.mxu1 %v5051_v26  ;;  %v5105_v24 = vcombine.high %v557_v18, %v561_v19  ;;  %v5107_v26 = vcombine.high %v558_v20, %v562_v21  ;;  %v99_v11 = vld [vmem:[#allocation5 + $0x70] sm:$0xff] }
 0x130   :  { %3389 = vmatpush1.bf16.msra.mxu0 %v5048_v30  ;;  %3553 = vmatpush1.bf16.msra.mxu1 %v5050_v31  ;;  %v5104_v30 = vcombine.low %v557_v18, %v561_v19  ;;  %v5106_v31 = vcombine.low %v558_v20, %v562_v21  ;;  %v103_v19 = vld [vmem:[#allocation5 + $0x90] sm:$0xff]  ;;  %v104_v21 = vld [vmem:[#allocation5 + $0x98] sm:$0xff] }
 0x131   :  { %3390 = vmatprep.subr.bf16.mxu0 %v5057_v32  ;;  %3554 = vmatprep.subr.bf16.mxu1 %v5059_v33  ;;  %v5113_v32 = vcombine.high %v565_v27, %v569_v28  ;;  %v5115_v33 = vcombine.high %v566_v29, %v570_v59  ;;  %v107_v20 = vld [vmem:[#allocation5 + $0xb0] sm:$0xff] }
 0x134   :  { %3391 = vmatpush1.bf16.msra.mxu0 %v5056_v40  ;;  %3555 = vmatpush1.bf16.msra.mxu1 %v5058_v41  ;;  %v5112_v40 = vcombine.low %v565_v27, %v569_v28  ;;  %v5114_v41 = vcombine.low %v566_v29, %v570_v59  ;;  %v111_v28 = vld [vmem:[#allocation5 + $0xd0] sm:$0xff]  ;;  %v112_v59 = vld [vmem:[#allocation5 + $0xd8] sm:$0xff] }
 0x135   :  { %3392 = vmatprep.subr.bf16.mxu0 %v5065_v44  ;;  %3556 = vmatprep.subr.bf16.mxu1 %v5067_v45  ;;  %v5121_v44 = vcombine.high %v573_v34, %v577_v35  ;;  %v5123_v45 = vcombine.high %v574_v38, %v578_v39  ;;  %v115_v29 = vld [vmem:[#allocation5 + $0xf0] sm:$0xff] }
 0x138   :  { %3393 = vmatpush1.bf16.msra.mxu0 %v5064_v49  ;;  %3557 = vmatpush1.bf16.msra.mxu1 %v5066_v50  ;;  %v5120_v49 = vcombine.low %v573_v34, %v577_v35  ;;  %v5122_v50 = vcombine.low %v574_v38, %v578_v39  ;;  %v119_v35 = vld [vmem:[#allocation5 + $0x110] sm:$0xff]  ;;  %v120_v39 = vld [vmem:[#allocation5 + $0x118] sm:$0xff] }
 0x139   :  { %3394 = vmatprep.subr.bf16.mxu0 %v5073_v51  ;;  %3558 = vmatprep.subr.bf16.mxu1 %v5075_v52  ;;  %v5129_v51 = vcombine.high %v581_v46, %v585_v53  ;;  %v5131_v52 = vcombine.high %v582_v47, %v586_v48  ;;  %v123_v38 = vld [vmem:[#allocation5 + $0x130] sm:$0xff] }
 0x13c   :  { %3395 = vmatpush1.bf16.msra.mxu0 %v5072_v58  ;;  %3559 = vmatpush1.bf16.msra.mxu1 %v5074_v60  ;;  %v5128_v58 = vcombine.low %v581_v46, %v585_v53  ;;  %v5130_v60 = vcombine.low %v582_v47, %v586_v48  ;;  %v127_v46 = vld [vmem:[#allocation5 + $0x150] sm:$0xff]  ;;  %v128_v47 = vld [vmem:[#allocation5 + $0x158] sm:$0xff] }
 0x13d   :  { %3396 = vmatprep.subr.bf16.mxu0 %v5081_v61  ;;  %3560 = vmatprep.subr.bf16.mxu1 %v5083_v62  ;;  %v5137_v61 = vcombine.high %v589_v54, %v593_v55  ;;  %v5139_v62 = vcombine.high %v590_v56, %v594_v57  ;;  %v131_v53 = vld [vmem:[#allocation5 + $0x170] sm:$0xff]  ;;  %v132_v48 = vld [vmem:[#allocation5 + $0x178] sm:$0xff] }
 0x140   :  { %3397 = vmatpush1.bf16.msra.mxu0 %v5080_v5  ;;  %3561 = vmatpush1.bf16.msra.mxu1 %v5082_v6  ;;  %v5136_v5 = vcombine.low %v589_v54, %v593_v55  ;;  %v5138_v6 = vcombine.low %v590_v56, %v594_v57  ;;  %v135_v54 = vld [vmem:[#allocation5 + $0x190] sm:$0xff]  ;;  %v136_v56 = vld [vmem:[#allocation5 + $0x198] sm:$0xff] }
 0x141   :  { %3398 = vmatprep.subr.bf16.mxu0 %v5089_v7  ;;  %3562 = vmatprep.subr.bf16.mxu1 %v5091_v8  ;;  %v4637_v7 = vcombine.high %v87_v0, %v91_v1  ;;  %v4639_v8 = vcombine.high %v88_v3, %v92_v4  ;;  %v139_v55 = vld [vmem:[#allocation5 + $0x1b0] sm:$0xff]  ;;  %v140_v57 = vld [vmem:[#allocation5 + $0x1b8] sm:$0xff] }
 0x144   :  { %3399 = vmatpush1.bf16.msra.mxu0 %v5088_v14  ;;  %3563 = vmatpush1.bf16.msra.mxu1 %v5090_v15  ;;  %v100_v14 = vld [vmem:[#allocation5 + $0x78] sm:$0xff]  ;;  %v4636_v15 = vcombine.low %v87_v0, %v91_v1  ;;  %v143_v0 = vld [vmem:[#allocation5 + $0x1d0] sm:$0xff] }
 0x145   :  { %3400 = vmatprep.subr.bf16.mxu0 %v5097_v16  ;;  %3564 = vmatprep.subr.bf16.mxu1 %v5099_v17  ;;  %v4638_v16 = vcombine.low %v88_v3, %v92_v4  ;;  %v4645_v17 = vcombine.high %v95_v10, %v99_v11  ;;  %v4647_v18 = vcombine.high %v96_v13, %v100_v14  ;;  %v147_v1 = vld [vmem:[#allocation5 + $0x1f0] sm:$0xff]  ;;  %v144_v3 = vld [vmem:[#allocation5 + $0x1d8] sm:$0xff] }
 0x146   :  { %v148_v4 = vld [vmem:[#allocation5 + $0x1f8] sm:$0xff] }
 0x148   :  { %3401 = vmatpush1.bf16.msra.mxu0 %v5096_v22  ;;  %3565 = vmatpush1.bf16.msra.mxu1 %v5098_v23  ;;  %v108_v22 = vld [vmem:[#allocation5 + $0xb8] sm:$0xff]  ;;  %v4644_v23 = vcombine.low %v95_v10, %v99_v11  ;;  %v151_v10 = vld [vmem:[#allocation5 + $0x210] sm:$0xff] }
 0x149   :  { %3402 = vmatprep.subr.bf16.mxu0 %v5105_v24  ;;  %3566 = vmatprep.subr.bf16.mxu1 %v5107_v26  ;;  %v4646_v24 = vcombine.low %v96_v13, %v100_v14  ;;  %v4653_v26 = vcombine.high %v103_v19, %v107_v20  ;;  %v4655_v27 = vcombine.high %v104_v21, %v108_v22  ;;  %v155_v11 = vld [vmem:[#allocation5 + $0x230] sm:$0xff]  ;;  %v152_v13 = vld [vmem:[#allocation5 + $0x218] sm:$0xff] }
 0x14a   :  { %v156_v14 = vld [vmem:[#allocation5 + $0x238] sm:$0xff] }
 0x14c   :  { %3403 = vmatpush1.bf16.msra.mxu0 %v5104_v30  ;;  %3567 = vmatpush1.bf16.msra.mxu1 %v5106_v31  ;;  %v116_v30 = vld [vmem:[#allocation5 + $0xf8] sm:$0xff]  ;;  %v4652_v31 = vcombine.low %v103_v19, %v107_v20  ;;  %v159_v19 = vld [vmem:[#allocation5 + $0x250] sm:$0xff] }
 0x14d   :  { %3404 = vmatprep.subr.bf16.mxu0 %v5113_v32  ;;  %3568 = vmatprep.subr.bf16.mxu1 %v5115_v33  ;;  %v4654_v32 = vcombine.low %v104_v21, %v108_v22  ;;  %v4661_v33 = vcombine.high %v111_v28, %v115_v29  ;;  %v4663_v34 = vcombine.high %v112_v59, %v116_v30  ;;  %v163_v20 = vld [vmem:[#allocation5 + $0x270] sm:$0xff]  ;;  %v160_v21 = vld [vmem:[#allocation5 + $0x258] sm:$0xff] }
 0x14e   :  { %v164_v22 = vld [vmem:[#allocation5 + $0x278] sm:$0xff] }
 0x150   :  { %3405 = vmatpush1.bf16.msra.mxu0 %v5112_v40  ;;  %3569 = vmatpush1.bf16.msra.mxu1 %v5114_v41  ;;  %v124_v40 = vld [vmem:[#allocation5 + $0x138] sm:$0xff]  ;;  %v4660_v41 = vcombine.low %v111_v28, %v115_v29  ;;  %v167_v28 = vld [vmem:[#allocation5 + $0x290] sm:$0xff] }
 0x151   :  { %3406 = vmatprep.subr.bf16.mxu0 %v5121_v44  ;;  %3570 = vmatprep.subr.bf16.mxu1 %v5123_v45  ;;  %v4662_v44 = vcombine.low %v112_v59, %v116_v30  ;;  %v4669_v45 = vcombine.high %v119_v35, %v123_v38  ;;  %v171_v29 = vld [vmem:[#allocation5 + $0x2b0] sm:$0xff]  ;;  %v168_v59 = vld [vmem:[#allocation5 + $0x298] sm:$0xff] }
 0x152   :  { %v172_v30 = vld [vmem:[#allocation5 + $0x2b8] sm:$0xff] }
 0x154   :  { %3407 = vmatpush1.bf16.msra.mxu0 %v5120_v49  ;;  %3571 = vmatpush1.bf16.msra.mxu1 %v5122_v50  ;;  %v4668_v49 = vcombine.low %v119_v35, %v123_v38  ;;  %v4670_v50 = vcombine.low %v120_v39, %v124_v40  ;;  %v175_v35 = vld [vmem:[#allocation5 + $0x2d0] sm:$0xff] }
 0x155   :  { %3408 = vmatprep.subr.bf16.mxu0 %v5129_v51  ;;  %3572 = vmatprep.subr.bf16.mxu1 %v5131_v52  ;;  %v4677_v51 = vcombine.high %v127_v46, %v131_v53  ;;  %v4679_v52 = vcombine.high %v128_v47, %v132_v48  ;;  %v179_v38 = vld [vmem:[#allocation5 + $0x2f0] sm:$0xff] }
 0x158   :  { %3409 = vmatpush1.bf16.msra.mxu0 %v5128_v58  ;;  %3573 = vmatpush1.bf16.msra.mxu1 %v5130_v60  ;;  %v4676_v58 = vcombine.low %v127_v46, %v131_v53  ;;  %v4678_v60 = vcombine.low %v128_v47, %v132_v48  ;;  %v183_v46 = vld [vmem:[#allocation5 + $0x310] sm:$0xff]  ;;  %v184_v47 = vld [vmem:[#allocation5 + $0x318] sm:$0xff] }
 0x159   :  { %3410 = vmatprep.subr.bf16.mxu0 %v5137_v61  ;;  %3574 = vmatprep.subr.bf16.mxu1 %v5139_v62  ;;  %v4685_v61 = vcombine.high %v135_v54, %v139_v55  ;;  %v4687_v62 = vcombine.high %v136_v56, %v140_v57  ;;  %v187_v53 = vld [vmem:[#allocation5 + $0x330] sm:$0xff]  ;;  %v188_v48 = vld [vmem:[#allocation5 + $0x338] sm:$0xff] }
 0x15c   :  { %3411 = vmatpush1.bf16.msra.mxu0 %v5136_v5  ;;  %3575 = vmatpush1.bf16.msra.mxu1 %v5138_v6  ;;  %v4684_v5 = vcombine.low %v135_v54, %v139_v55  ;;  %v4686_v6 = vcombine.low %v136_v56, %v140_v57  ;;  %v191_v54 = vld [vmem:[#allocation5 + $0x350] sm:$0xff]  ;;  %v192_v56 = vld [vmem:[#allocation5 + $0x358] sm:$0xff] }
 0x15d   :  { %3585 = vmatprep.subr.bf16.mxu0 %v4637_v7  ;;  %3749 = vmatprep.subr.bf16.mxu1 %v4639_v8  ;;  %v4693_v7 = vcombine.high %v143_v0, %v147_v1  ;;  %v4695_v8 = vcombine.high %v144_v3, %v148_v4  ;;  %v195_v55 = vld [vmem:[#allocation5 + $0x370] sm:$0xff]  ;;  %v196_v57 = vld [vmem:[#allocation5 + $0x378] sm:$0xff] }
 0x15f   :  { %3413 = vmatmul.mubr.bf16.vlgmr.msra.gmra.mrb[0].mxu0 %v5732_v12  ;;  %3577 = vmatmul.mubr.bf16.vlgmr.msra.gmra.mrb[0].mxu1 %v5732_v12 }
 0x160   :  { %3586 = vmatpush1.bf16.msra.mxu0 %v4636_v15  ;;  %3750 = vmatpush1.bf16.msra.mxu1 %v4638_v16  ;;  %v4692_v15 = vcombine.low %v143_v0, %v147_v1  ;;  %v4694_v16 = vcombine.low %v144_v3, %v148_v4  ;;  %v199_v0 = vld [vmem:[#allocation5 + $0x390] sm:$0xff]  ;;  %v200_v3 = vld [vmem:[#allocation5 + $0x398] sm:$0xff] }
 0x161   :  { %3587 = vmatprep.subr.bf16.mxu0 %v4645_v17  ;;  %3751 = vmatprep.subr.bf16.mxu1 %v4647_v18  ;;  %v4701_v17 = vcombine.high %v151_v10, %v155_v11  ;;  %v4703_v18 = vcombine.high %v152_v13, %v156_v14  ;;  %v203_v1 = vld [vmem:[#allocation5 + $0x3b0] sm:$0xff]  ;;  %v204_v4 = vld [vmem:[#allocation5 + $0x3b8] sm:$0xff] }
 0x162   :  { %3617 = vmatprep.mubr.bf16.mxu0 %v5689_v9  ;;  %3781 = vmatprep.mubr.bf16.mxu1 %v5689_v9  ;;  %v4671_v9 = vcombine.high %v120_v39, %v124_v40  ;;  %v176_v39 = vld [vmem:[#allocation5 + $0x2d8] sm:$0xff] }
 0x163   :  { %v180_v40 = vld [vmem:[#allocation5 + $0x2f8] sm:$0xff] }
 0x164   :  { %3588 = vmatpush1.bf16.msra.mxu0 %v4644_v23  ;;  %3752 = vmatpush1.bf16.msra.mxu1 %v4646_v24  ;;  %v4700_v23 = vcombine.low %v151_v10, %v155_v11  ;;  %v4702_v24 = vcombine.low %v152_v13, %v156_v14  ;;  %v207_v10 = vld [vmem:[#allocation5 + $0x3d0] sm:$0xff]  ;;  %v208_v13 = vld [vmem:[#allocation5 + $0x3d8] sm:$0xff] }
 0x165   :  { %3589 = vmatprep.subr.bf16.mxu0 %v4653_v26  ;;  %3753 = vmatprep.subr.bf16.mxu1 %v4655_v27  ;;  %v4709_v26 = vcombine.high %v159_v19, %v163_v20  ;;  %v4711_v27 = vcombine.high %v160_v21, %v164_v22  ;;  %v211_v11 = vld [vmem:[#allocation5 + $0x3f0] sm:$0xff]  ;;  %v212_v14 = vld [vmem:[#allocation5 + $0x3f8] sm:$0xff] }
 0x168   :  { %3590 = vmatpush1.bf16.msra.mxu0 %v4652_v31  ;;  %3754 = vmatpush1.bf16.msra.mxu1 %v4654_v32  ;;  %v4708_v31 = vcombine.low %v159_v19, %v163_v20  ;;  %v4710_v32 = vcombine.low %v160_v21, %v164_v22  ;;  %v215_v19 = vld [vmem:[#allocation5 + $0x410] sm:$0xff]  ;;  %v216_v21 = vld [vmem:[#allocation5 + $0x418] sm:$0xff] }
 0x169   :  { %3591 = vmatprep.subr.bf16.mxu0 %v4661_v33  ;;  %3755 = vmatprep.subr.bf16.mxu1 %v4663_v34  ;;  %v4717_v33 = vcombine.high %v167_v28, %v171_v29  ;;  %v4719_v34 = vcombine.high %v168_v59, %v172_v30  ;;  %v219_v20 = vld [vmem:[#allocation5 + $0x430] sm:$0xff]  ;;  %v220_v22 = vld [vmem:[#allocation5 + $0x438] sm:$0xff] }
 0x16c   :  { %3592 = vmatpush1.bf16.msra.mxu0 %v4660_v41  ;;  %3756 = vmatpush1.bf16.msra.mxu1 %v4662_v44  ;;  %v4716_v41 = vcombine.low %v167_v28, %v171_v29  ;;  %v4718_v44 = vcombine.low %v168_v59, %v172_v30  ;;  %v223_v28 = vld [vmem:[#allocation5 + $0x450] sm:$0xff]  ;;  %v224_v59 = vld [vmem:[#allocation5 + $0x458] sm:$0xff] }
 0x16d   :  { %3593 = vmatprep.subr.bf16.mxu0 %v4669_v45  ;;  %3757 = vmatprep.subr.bf16.mxu1 %v4671_v9  ;;  %v4725_v45 = vcombine.high %v175_v35, %v179_v38  ;;  %v4727_v9 = vcombine.high %v176_v39, %v180_v40  ;;  %v227_v29 = vld [vmem:[#allocation5 + $0x470] sm:$0xff]  ;;  %v228_v30 = vld [vmem:[#allocation5 + $0x478] sm:$0xff] }
 0x170   :  { %3594 = vmatpush1.bf16.msra.mxu0 %v4668_v49  ;;  %3758 = vmatpush1.bf16.msra.mxu1 %v4670_v50  ;;  %v4724_v49 = vcombine.low %v175_v35, %v179_v38  ;;  %v4726_v50 = vcombine.low %v176_v39, %v180_v40  ;;  %v231_v35 = vld [vmem:[#allocation5 + $0x490] sm:$0xff]  ;;  %v232_v39 = vld [vmem:[#allocation5 + $0x498] sm:$0xff] }
 0x171   :  { %3595 = vmatprep.subr.bf16.mxu0 %v4677_v51  ;;  %3759 = vmatprep.subr.bf16.mxu1 %v4679_v52  ;;  %v4733_v51 = vcombine.high %v183_v46, %v187_v53  ;;  %v4735_v52 = vcombine.high %v184_v47, %v188_v48  ;;  %v235_v38 = vld [vmem:[#allocation5 + $0x4b0] sm:$0xff]  ;;  %v236_v40 = vld [vmem:[#allocation5 + $0x4b8] sm:$0xff] }
 0x174   :  { %3596 = vmatpush1.bf16.msra.mxu0 %v4676_v58  ;;  %3760 = vmatpush1.bf16.msra.mxu1 %v4678_v60  ;;  %v4732_v58 = vcombine.low %v183_v46, %v187_v53  ;;  %v4734_v60 = vcombine.low %v184_v47, %v188_v48  ;;  %v239_v46 = vld [vmem:[#allocation5 + $0x4d0] sm:$0xff]  ;;  %v240_v47 = vld [vmem:[#allocation5 + $0x4d8] sm:$0xff] }
 0x175   :  { %3597 = vmatprep.subr.bf16.mxu0 %v4685_v61  ;;  %3761 = vmatprep.subr.bf16.mxu1 %v4687_v62  ;;  %v4741_v61 = vcombine.high %v191_v54, %v195_v55  ;;  %v4743_v62 = vcombine.high %v192_v56, %v196_v57  ;;  %v243_v53 = vld [vmem:[#allocation5 + $0x4f0] sm:$0xff]  ;;  %v244_v48 = vld [vmem:[#allocation5 + $0x4f8] sm:$0xff] }
 0x178   :  { %3598 = vmatpush1.bf16.msra.mxu0 %v4684_v5  ;;  %3762 = vmatpush1.bf16.msra.mxu1 %v4686_v6  ;;  %v4740_v5 = vcombine.low %v191_v54, %v195_v55  ;;  %v4742_v6 = vcombine.low %v192_v56, %v196_v57  ;;  %v251_v54 = vld [vmem:[#allocation5 + $0x530] sm:$0xff]  ;;  %v248_v55 = vld [vmem:[#allocation5 + $0x518] sm:$0xff]  ;;  %v4788_v57 = vcombine.low %v239_v46, %v243_v53 }
 0x179   :  { %3599 = vmatprep.subr.bf16.mxu0 %v4693_v7  ;;  %3763 = vmatprep.subr.bf16.mxu1 %v4695_v8  ;;  %v4749_v7 = vcombine.high %v199_v0, %v203_v1  ;;  %v4751_v8 = vcombine.high %v200_v3, %v204_v4  ;;  %v252_v56 = vld [vmem:[#allocation5 + $0x538] sm:$0xff] }
 0x17c   :  { %3600 = vmatpush1.bf16.msra.mxu0 %v4692_v15  ;;  %3764 = vmatpush1.bf16.msra.mxu1 %v4694_v16  ;;  %v4748_v15 = vcombine.low %v199_v0, %v203_v1  ;;  %v4750_v16 = vcombine.low %v200_v3, %v204_v4  ;;  %v256_v0 = vld [vmem:[#allocation5 + $0x558] sm:$0xff]  ;;  %v4798_v4 = vcombine.low %v248_v55, %v252_v56 }
 0x17d   :  { %3601 = vmatprep.subr.bf16.mxu0 %v4701_v17  ;;  %3765 = vmatprep.subr.bf16.mxu1 %v4703_v18  ;;  %v4757_v17 = vcombine.high %v207_v10, %v211_v11  ;;  %v4759_v18 = vcombine.high %v208_v13, %v212_v14  ;;  %v260_v1 = vld [vmem:[#allocation5 + $0x578] sm:$0xff] }
 0x180   :  { %3602 = vmatpush1.bf16.msra.mxu0 %v4700_v23  ;;  %3766 = vmatpush1.bf16.msra.mxu1 %v4702_v24  ;;  %v4756_v23 = vcombine.low %v207_v10, %v211_v11  ;;  %v4758_v24 = vcombine.low %v208_v13, %v212_v14  ;;  %v264_v10 = vld [vmem:[#allocation5 + $0x598] sm:$0xff]  ;;  %v4806_v14 = vcombine.low %v256_v0, %v260_v1 }
 0x181   :  { %3603 = vmatprep.subr.bf16.mxu0 %v4709_v26  ;;  %3767 = vmatprep.subr.bf16.mxu1 %v4711_v27  ;;  %v4765_v26 = vcombine.high %v215_v19, %v219_v20  ;;  %v4767_v27 = vcombine.high %v216_v21, %v220_v22  ;;  %v268_v11 = vld [vmem:[#allocation5 + $0x5b8] sm:$0xff] }
 0x184   :  { %3604 = vmatpush1.bf16.msra.mxu0 %v4708_v31  ;;  %3768 = vmatpush1.bf16.msra.mxu1 %v4710_v32  ;;  %v4764_v31 = vcombine.low %v215_v19, %v219_v20  ;;  %v4766_v32 = vcombine.low %v216_v21, %v220_v22  ;;  %v272_v19 = vld [vmem:[#allocation5 + $0x5d8] sm:$0xff]  ;;  %v4814_v22 = vcombine.low %v264_v10, %v268_v11 }
 0x185   :  { %3605 = vmatprep.subr.bf16.mxu0 %v4717_v33  ;;  %3769 = vmatprep.subr.bf16.mxu1 %v4719_v34  ;;  %v4773_v33 = vcombine.high %v223_v28, %v227_v29  ;;  %v4775_v34 = vcombine.high %v224_v59, %v228_v30  ;;  %v276_v20 = vld [vmem:[#allocation5 + $0x5f8] sm:$0xff] }
 0x188   :  { %3606 = vmatpush1.bf16.msra.mxu0 %v4716_v41  ;;  %3770 = vmatpush1.bf16.msra.mxu1 %v4718_v44  ;;  %v4772_v41 = vcombine.low %v223_v28, %v227_v29  ;;  %v4774_v44 = vcombine.low %v224_v59, %v228_v30  ;;  %v280_v28 = vld [vmem:[#allocation5 + $0x618] sm:$0xff]  ;;  %v4822_v30 = vcombine.low %v272_v19, %v276_v20 }
 0x189   :  { %3607 = vmatprep.subr.bf16.mxu0 %v4725_v45  ;;  %3771 = vmatprep.subr.bf16.mxu1 %v4727_v9  ;;  %v4781_v45 = vcombine.high %v231_v35, %v235_v38  ;;  %v4783_v9 = vcombine.high %v232_v39, %v236_v40  ;;  %v284_v29 = vld [vmem:[#allocation5 + $0x638] sm:$0xff] }
 0x18c   :  { %3608 = vmatpush1.bf16.msra.mxu0 %v4724_v49  ;;  %3772 = vmatpush1.bf16.msra.mxu1 %v4726_v50  ;;  %v4780_v49 = vcombine.low %v231_v35, %v235_v38  ;;  %v4789_v50 = vcombine.high %v239_v46, %v243_v53  ;;  %v288_v35 = vld [vmem:[#allocation5 + $0x658] sm:$0xff] }
 0x18d   :  { %3609 = vmatprep.subr.bf16.mxu0 %v4733_v51  ;;  %3773 = vmatprep.subr.bf16.mxu1 %v4735_v52  ;;  %v4791_v51 = vcombine.high %v240_v47, %v244_v48  ;;  %v247_v52 = vld [vmem:[#allocation5 + $0x510] sm:$0xff]  ;;  %v292_v38 = vld [vmem:[#allocation5 + $0x678] sm:$0xff] }
 0x18e   :  { %v4796_v3 = vcombine.low %v247_v52, %v251_v54  ;;  %v296_v46 = vld [vmem:[#allocation5 + $0x698] sm:$0xff] }
 0x18f   :  { %v300_v53 = vld [vmem:[#allocation5 + $0x6b8] sm:$0xff] }
 0x190   :  { %3610 = vmatpush1.bf16.msra.mxu0 %v4732_v58  ;;  %3774 = vmatpush1.bf16.msra.mxu1 %v4734_v60  ;;  %v4790_v58 = vcombine.low %v240_v47, %v244_v48  ;;  %v4797_v60 = vcombine.high %v247_v52, %v251_v54  ;;  %v4838_v48 = vcombine.low %v288_v35, %v292_v38  ;;  %v304_v52 = vld [vmem:[#allocation5 + $0x6d8] sm:$0xff] }
 0x191   :  { %3611 = vmatprep.subr.bf16.mxu0 %v4741_v61  ;;  %3775 = vmatprep.subr.bf16.mxu1 %v4743_v62  ;;  %v255_v61 = vld [vmem:[#allocation5 + $0x550] sm:$0xff]  ;;  %v308_v54 = vld [vmem:[#allocation5 + $0x6f8] sm:$0xff] }
 0x192   :  { %v259_v62 = vld [vmem:[#allocation5 + $0x570] sm:$0xff] }
 0x193   :  { %v4804_v13 = vcombine.low %v255_v61, %v259_v62 }
 0x194   :  { %3612 = vmatpush1.bf16.msra.mxu0 %v4740_v5  ;;  %3776 = vmatpush1.bf16.msra.mxu1 %v4742_v6  ;;  %v4805_v5 = vcombine.high %v255_v61, %v259_v62  ;;  %v4807_v6 = vcombine.high %v256_v0, %v260_v1  ;;  %v312_v61 = vld [vmem:[#allocation5 + $0x718] sm:$0xff]  ;;  %v4854_v1 = vcombine.low %v304_v52, %v308_v54 }
 0x195   :  { %3613 = vmatprep.subr.bf16.mxu0 %v4749_v7  ;;  %3777 = vmatprep.subr.bf16.mxu1 %v4751_v8  ;;  %v263_v7 = vld [vmem:[#allocation5 + $0x590] sm:$0xff]  ;;  %v316_v62 = vld [vmem:[#allocation5 + $0x738] sm:$0xff] }
 0x196   :  { %v267_v8 = vld [vmem:[#allocation5 + $0x5b0] sm:$0xff] }
 0x197   :  { %v4812_v21 = vcombine.low %v263_v7, %v267_v8 }
 0x198   :  { %3614 = vmatpush1.bf16.msra.mxu0 %v4748_v15  ;;  %3778 = vmatpush1.bf16.msra.mxu1 %v4750_v16  ;;  %v4813_v15 = vcombine.high %v263_v7, %v267_v8  ;;  %v4815_v16 = vcombine.high %v264_v10, %v268_v11  ;;  %v320_v7 = vld [vmem:[#allocation5 + $0x758] sm:$0xff]  ;;  %v4862_v11 = vcombine.low %v312_v61, %v316_v62 }
 0x199   :  { %3615 = vmatprep.subr.bf16.mxu0 %v4757_v17  ;;  %3779 = vmatprep.subr.bf16.mxu1 %v4759_v18  ;;  %v271_v17 = vld [vmem:[#allocation5 + $0x5d0] sm:$0xff]  ;;  %v324_v8 = vld [vmem:[#allocation5 + $0x778] sm:$0xff] }
 0x19a   :  { %v275_v18 = vld [vmem:[#allocation5 + $0x5f0] sm:$0xff] }
 0x19b   :  { %v4820_v59 = vcombine.low %v271_v17, %v275_v18 }
 0x19c   :  { %3616 = vmatpush1.bf16.msra.mxu0 %v4756_v23  ;;  %3780 = vmatpush1.bf16.msra.mxu1 %v4758_v24  ;;  %v4821_v23 = vcombine.high %v271_v17, %v275_v18  ;;  %v4823_v24 = vcombine.high %v272_v19, %v276_v20  ;;  %v328_v17 = vld [vmem:[#allocation5 + $0x798] sm:$0xff]  ;;  %v4870_v20 = vcombine.low %v320_v7, %v324_v8 }
 0x19d   :  { %3626 = vmatprep.subr.bf16.mxu0 %v4765_v26  ;;  %3790 = vmatprep.subr.bf16.mxu1 %v4767_v27  ;;  %v279_v26 = vld [vmem:[#allocation5 + $0x610] sm:$0xff]  ;;  %v332_v18 = vld [vmem:[#allocation5 + $0x7b8] sm:$0xff] }
 0x19e   :  { %v283_v27 = vld [vmem:[#allocation5 + $0x630] sm:$0xff] }
 0x19f   :  { %3618 = vmatmul.mubr.bf16.vlgmr.msra.gmra.mrb[4].mxu0 %v5698_v25  ;;  %3782 = vmatmul.mubr.bf16.vlgmr.msra.gmra.mrb[4].mxu1 %v5698_v25  ;;  %v4782_v25 = vcombine.low %v232_v39, %v236_v40  ;;  %v4828_v39 = vcombine.low %v279_v26, %v283_v27  ;;  %v4830_v40 = vcombine.low %v280_v28, %v284_v29 }
 0x1a0   :  { %3627 = vmatpush1.bf16.msra.mxu0 %v4764_v31  ;;  %3791 = vmatpush1.bf16.msra.mxu1 %v4766_v32  ;;  %v4829_v31 = vcombine.high %v279_v26, %v283_v27  ;;  %v4831_v32 = vcombine.high %v280_v28, %v284_v29  ;;  %v336_v26 = vld [vmem:[#allocation5 + $0x7d8] sm:$0xff]  ;;  %v4878_v29 = vcombine.low %v328_v17, %v332_v18 }
 0x1a1   :  { %3628 = vmatprep.subr.bf16.mxu0 %v4773_v33  ;;  %3792 = vmatprep.subr.bf16.mxu1 %v4775_v34  ;;  %v287_v33 = vld [vmem:[#allocation5 + $0x650] sm:$0xff]  ;;  %v340_v27 = vld [vmem:[#allocation5 + $0x7f8] sm:$0xff] }
 0x1a2   :  { %3658 = vmatprep.mubr.bf16.mxu0 %v5702_v36  ;;  %3822 = vmatprep.mubr.bf16.mxu1 %v5702_v36  ;;  %v4799_v36 = vcombine.high %v248_v55, %v252_v56  ;;  %v291_v34 = vld [vmem:[#allocation5 + $0x670] sm:$0xff]  ;;  %v4846_v56 = vcombine.low %v296_v46, %v300_v53 }
 0x1a3   :  { %v4836_v47 = vcombine.low %v287_v33, %v291_v34 }
 0x1a4   :  { %3629 = vmatpush1.bf16.msra.mxu0 %v4772_v41  ;;  %3793 = vmatpush1.bf16.msra.mxu1 %v4774_v44  ;;  %v4837_v41 = vcombine.high %v287_v33, %v291_v34  ;;  %v4839_v44 = vcombine.high %v288_v35, %v292_v38  ;;  %v344_v33 = vld [vmem:[#allocation5 + $0x818] sm:$0xff]  ;;  %v4886_v38 = vcombine.low %v336_v26, %v340_v27 }
 0x1a5   :  { %3630 = vmatprep.subr.bf16.mxu0 %v4781_v45  ;;  %3794 = vmatprep.subr.bf16.mxu1 %v4783_v9  ;;  %v295_v45 = vld [vmem:[#allocation5 + $0x690] sm:$0xff]  ;;  %v348_v34 = vld [vmem:[#allocation5 + $0x838] sm:$0xff] }
 0x1a6   :  { %v299_v9 = vld [vmem:[#allocation5 + $0x6b0] sm:$0xff] }
 0x1a7   :  { %v4844_v55 = vcombine.low %v295_v45, %v299_v9 }
 0x1a8   :  { %3631 = vmatpush1.bf16.msra.mxu0 %v4780_v49  ;;  %3795 = vmatpush1.bf16.msra.mxu1 %v4782_v25  ;;  %v4845_v49 = vcombine.high %v295_v45, %v299_v9  ;;  %v4847_v25 = vcombine.high %v296_v46, %v300_v53  ;;  %v352_v45 = vld [vmem:[#allocation5 + $0x858] sm:$0xff]  ;;  %v4894_v53 = vcombine.low %v344_v33, %v348_v34 }
 0x1a9   :  { %3632 = vmatprep.subr.bf16.mxu0 %v4789_v50  ;;  %3796 = vmatprep.subr.bf16.mxu1 %v4791_v51  ;;  %v303_v50 = vld [vmem:[#allocation5 + $0x6d0] sm:$0xff]  ;;  %v356_v9 = vld [vmem:[#allocation5 + $0x878] sm:$0xff] }
 0x1aa   :  { %v307_v51 = vld [vmem:[#allocation5 + $0x6f0] sm:$0xff] }
 0x1ab   :  { %v4852_v0 = vcombine.low %v303_v50, %v307_v51 }
 0x1ac   :  { %3633 = vmatpush1.bf16.msra.mxu0 %v4788_v57  ;;  %3797 = vmatpush1.bf16.msra.mxu1 %v4790_v58  ;;  %v4853_v57 = vcombine.high %v303_v50, %v307_v51  ;;  %v4855_v58 = vcombine.high %v304_v52, %v308_v54  ;;  %v360_v50 = vld [vmem:[#allocation5 + $0x898] sm:$0xff]  ;;  %v4902_v54 = vcombine.low %v352_v45, %v356_v9 }
 0x1ad   :  { %3634 = vmatprep.subr.bf16.mxu0 %v4797_v60  ;;  %3798 = vmatprep.subr.bf16.mxu1 %v4799_v36  ;;  %v311_v60 = vld [vmem:[#allocation5 + $0x710] sm:$0xff]  ;;  %v364_v51 = vld [vmem:[#allocation5 + $0x8b8] sm:$0xff] }
 0x1ae   :  { %v315_v36 = vld [vmem:[#allocation5 + $0x730] sm:$0xff] }
 0x1af   :  { %v4860_v10 = vcombine.low %v311_v60, %v315_v36 }
 0x1b0   :  { %3635 = vmatpush1.bf16.msra.mxu0 %v4796_v3  ;;  %3799 = vmatpush1.bf16.msra.mxu1 %v4798_v4  ;;  %v4861_v3 = vcombine.high %v311_v60, %v315_v36  ;;  %v4863_v4 = vcombine.high %v312_v61, %v316_v62  ;;  %v368_v60 = vld [vmem:[#allocation5 + $0x8d8] sm:$0xff] }
 0x1b1   :  { %3636 = vmatprep.subr.bf16.mxu0 %v4805_v5  ;;  %3800 = vmatprep.subr.bf16.mxu1 %v4807_v6  ;;  %v319_v5 = vld [vmem:[#allocation5 + $0x750] sm:$0xff]  ;;  %v372_v36 = vld [vmem:[#allocation5 + $0x8f8] sm:$0xff] }
 0x1b2   :  { %v323_v6 = vld [vmem:[#allocation5 + $0x770] sm:$0xff] }
 0x1b3   :  { %v4868_v19 = vcombine.low %v319_v5, %v323_v6 }
 0x1b4   :  { %3637 = vmatpush1.bf16.msra.mxu0 %v4804_v13  ;;  %3801 = vmatpush1.bf16.msra.mxu1 %v4806_v14  ;;  %v4869_v13 = vcombine.high %v319_v5, %v323_v6  ;;  %v4871_v14 = vcombine.high %v320_v7, %v324_v8  ;;  %v380_v5 = vld [vmem:[#allocation5 + $0x938] sm:$0xff]  ;;  %v4918_v7 = vcombine.low %v368_v60, %v372_v36 }
 0x1b5   :  { %3638 = vmatprep.subr.bf16.mxu0 %v4813_v15  ;;  %3802 = vmatprep.subr.bf16.mxu1 %v4815_v16  ;;  %v327_v15 = vld [vmem:[#allocation5 + $0x790] sm:$0xff] }
 0x1b6   :  { %v331_v16 = vld [vmem:[#allocation5 + $0x7b0] sm:$0xff] }
 0x1b7   :  { %v4876_v28 = vcombine.low %v327_v15, %v331_v16 }
 0x1b8   :  { %3639 = vmatpush1.bf16.msra.mxu0 %v4812_v21  ;;  %3803 = vmatpush1.bf16.msra.mxu1 %v4814_v22  ;;  %v4877_v21 = vcombine.high %v327_v15, %v331_v16  ;;  %v4879_v22 = vcombine.high %v328_v17, %v332_v18 }
 0x1b9   :  { %3640 = vmatprep.subr.bf16.mxu0 %v4821_v23  ;;  %3804 = vmatprep.subr.bf16.mxu1 %v4823_v24  ;;  %v335_v23 = vld [vmem:[#allocation5 + $0x7d0] sm:$0xff] }
 0x1ba   :  { %v339_v24 = vld [vmem:[#allocation5 + $0x7f0] sm:$0xff] }
 0x1bb   :  { %v4884_v35 = vcombine.low %v335_v23, %v339_v24 }
 0x1bc   :  { %3641 = vmatpush1.bf16.msra.mxu0 %v4820_v59  ;;  %3805 = vmatpush1.bf16.msra.mxu1 %v4822_v30  ;;  %v4885_v59 = vcombine.high %v335_v23, %v339_v24  ;;  %v4887_v30 = vcombine.high %v336_v26, %v340_v27 }
 0x1bd   :  { %3642 = vmatprep.subr.bf16.mxu0 %v4829_v31  ;;  %3806 = vmatprep.subr.bf16.mxu1 %v4831_v32  ;;  %v343_v31 = vld [vmem:[#allocation5 + $0x810] sm:$0xff] }
 0x1be   :  { %v347_v32 = vld [vmem:[#allocation5 + $0x830] sm:$0xff] }
 0x1bf   :  { %v4892_v46 = vcombine.low %v343_v31, %v347_v32 }
 0x1c0   :  { %3643 = vmatpush1.bf16.msra.mxu0 %v4828_v39  ;;  %3807 = vmatpush1.bf16.msra.mxu1 %v4830_v40  ;;  %v4893_v39 = vcombine.high %v343_v31, %v347_v32  ;;  %v4895_v40 = vcombine.high %v344_v33, %v348_v34 }
 0x1c1   :  { %3644 = vmatprep.subr.bf16.mxu0 %v4837_v41  ;;  %3808 = vmatprep.subr.bf16.mxu1 %v4839_v44  ;;  %v351_v41 = vld [vmem:[#allocation5 + $0x850] sm:$0xff] }
 0x1c2   :  { %v355_v44 = vld [vmem:[#allocation5 + $0x870] sm:$0xff] }
 0x1c3   :  { %v4900_v52 = vcombine.low %v351_v41, %v355_v44 }
 0x1c4   :  { %3645 = vmatpush1.bf16.msra.mxu0 %v4836_v47  ;;  %3809 = vmatpush1.bf16.msra.mxu1 %v4838_v48  ;;  %v4901_v47 = vcombine.high %v351_v41, %v355_v44  ;;  %v4903_v48 = vcombine.high %v352_v45, %v356_v9 }
 0x1c5   :  { %3646 = vmatprep.subr.bf16.mxu0 %v4845_v49  ;;  %3810 = vmatprep.subr.bf16.mxu1 %v4847_v25  ;;  %v359_v49 = vld [vmem:[#allocation5 + $0x890] sm:$0xff] }
 0x1c6   :  { %v363_v25 = vld [vmem:[#allocation5 + $0x8b0] sm:$0xff] }
 0x1c7   :  { %v4908_v61 = vcombine.low %v359_v49, %v363_v25 }
 0x1c8   :  { %3647 = vmatpush1.bf16.msra.mxu0 %v4844_v55  ;;  %3811 = vmatpush1.bf16.msra.mxu1 %v4846_v56  ;;  %v4909_v55 = vcombine.high %v359_v49, %v363_v25  ;;  %v4911_v56 = vcombine.high %v360_v50, %v364_v51 }
 0x1c9   :  { %3648 = vmatprep.subr.bf16.mxu0 %v4853_v57  ;;  %3812 = vmatprep.subr.bf16.mxu1 %v4855_v58  ;;  %v367_v57 = vld [vmem:[#allocation5 + $0x8d0] sm:$0xff] }
 0x1ca   :  { %v371_v58 = vld [vmem:[#allocation5 + $0x8f0] sm:$0xff] }
 0x1cb   :  { %v4917_v62 = vcombine.high %v367_v57, %v371_v58  ;;  %v4916_v6 = vcombine.low %v367_v57, %v371_v58 }
 0x1cc   :  { %3649 = vmatpush1.bf16.msra.mxu0 %v4852_v0  ;;  %3813 = vmatpush1.bf16.msra.mxu1 %v4854_v1  ;;  %v4919_v0 = vcombine.high %v368_v60, %v372_v36  ;;  %v375_v1 = vld [vmem:[#allocation5 + $0x910] sm:$0xff] }
 0x1cd   :  { %3650 = vmatprep.subr.bf16.mxu0 %v4861_v3  ;;  %3814 = vmatprep.subr.bf16.mxu1 %v4863_v4  ;;  %v379_v3 = vld [vmem:[#allocation5 + $0x930] sm:$0xff]  ;;  %v376_v4 = vld [vmem:[#allocation5 + $0x918] sm:$0xff] }
 0x1ce   :  { %v4925_v8 = vcombine.high %v375_v1, %v379_v3  ;;  %v4924_v15 = vcombine.low %v375_v1, %v379_v3  ;;  %v4926_v16 = vcombine.low %v376_v4, %v380_v5 }
 0x1d0   :  { %3651 = vmatpush1.bf16.msra.mxu0 %v4860_v10  ;;  %3815 = vmatpush1.bf16.msra.mxu1 %v4862_v11  ;;  %v383_v10 = vld [vmem:[#allocation5 + $0x950] sm:$0xff] }
 0x1d1   :  { %3652 = vmatprep.subr.bf16.mxu0 %v4869_v13  ;;  %3816 = vmatprep.subr.bf16.mxu1 %v4871_v14  ;;  %v387_v11 = vld [vmem:[#allocation5 + $0x970] sm:$0xff]  ;;  %v384_v13 = vld [vmem:[#allocation5 + $0x958] sm:$0xff] }
 0x1d2   :  { %v388_v14 = vld [vmem:[#allocation5 + $0x978] sm:$0xff]  ;;  %v4933_v17 = vcombine.high %v383_v10, %v387_v11  ;;  %v4932_v23 = vcombine.low %v383_v10, %v387_v11 }
 0x1d3   :  { %v4935_v18 = vcombine.high %v384_v13, %v388_v14  ;;  %v4934_v24 = vcombine.low %v384_v13, %v388_v14 }
 0x1d4   :  { %3653 = vmatpush1.bf16.msra.mxu0 %v4868_v19  ;;  %3817 = vmatpush1.bf16.msra.mxu1 %v4870_v20  ;;  %v391_v19 = vld [vmem:[#allocation5 + $0x990] sm:$0xff] }
 0x1d5   :  { %3654 = vmatprep.subr.bf16.mxu0 %v4877_v21  ;;  %3818 = vmatprep.subr.bf16.mxu1 %v4879_v22  ;;  %v395_v20 = vld [vmem:[#allocation5 + $0x9b0] sm:$0xff]  ;;  %v392_v21 = vld [vmem:[#allocation5 + $0x998] sm:$0xff] }
 0x1d6   :  { %v396_v22 = vld [vmem:[#allocation5 + $0x9b8] sm:$0xff]  ;;  %v4941_v26 = vcombine.high %v391_v19, %v395_v20  ;;  %v4940_v31 = vcombine.low %v391_v19, %v395_v20 }
 0x1d7   :  { %v4943_v27 = vcombine.high %v392_v21, %v396_v22  ;;  %v4942_v32 = vcombine.low %v392_v21, %v396_v22 }
 0x1d8   :  { %3655 = vmatpush1.bf16.msra.mxu0 %v4876_v28  ;;  %3819 = vmatpush1.bf16.msra.mxu1 %v4878_v29  ;;  %v399_v28 = vld [vmem:[#allocation5 + $0x9d0] sm:$0xff] }
 0x1d9   :  { %3656 = vmatprep.subr.bf16.mxu0 %v4885_v59  ;;  %3820 = vmatprep.subr.bf16.mxu1 %v4887_v30  ;;  %v403_v29 = vld [vmem:[#allocation5 + $0x9f0] sm:$0xff]  ;;  %v400_v59 = vld [vmem:[#allocation5 + $0x9d8] sm:$0xff] }
 0x1da   :  { %v404_v30 = vld [vmem:[#allocation5 + $0x9f8] sm:$0xff]  ;;  %v4949_v33 = vcombine.high %v399_v28, %v403_v29  ;;  %v4948_v41 = vcombine.low %v399_v28, %v403_v29 }
 0x1db   :  { %v4951_v34 = vcombine.high %v400_v59, %v404_v30  ;;  %v4950_v44 = vcombine.low %v400_v59, %v404_v30 }
 0x1dc   :  { %3657 = vmatpush1.bf16.msra.mxu0 %v4884_v35  ;;  %3821 = vmatpush1.bf16.msra.mxu1 %v4886_v38  ;;  %v407_v35 = vld [vmem:[#allocation5 + $0xa10] sm:$0xff] }
 0x1dd   :  { %3667 = vmatprep.subr.bf16.mxu0 %v4893_v39  ;;  %3831 = vmatprep.subr.bf16.mxu1 %v4895_v40  ;;  %v411_v38 = vld [vmem:[#allocation5 + $0xa30] sm:$0xff]  ;;  %v408_v39 = vld [vmem:[#allocation5 + $0xa18] sm:$0xff] }
 0x1de   :  { %v412_v40 = vld [vmem:[#allocation5 + $0xa38] sm:$0xff]  ;;  %v4957_v45 = vcombine.high %v407_v35, %v411_v38  ;;  %v4956_v49 = vcombine.low %v407_v35, %v411_v38 }
 0x1df   :  { %3659 = vmatmul.mubr.bf16.vlgmr.msra.gmra.mrb[4].mxu0 %v5716_v42  ;;  %3823 = vmatmul.mubr.bf16.vlgmr.msra.gmra.mrb[4].mxu1 %v5716_v42  ;;  %v4910_v42 = vcombine.low %v360_v50, %v364_v51  ;;  %v4959_v9 = vcombine.high %v408_v39, %v412_v40  ;;  %v4958_v25 = vcombine.low %v408_v39, %v412_v40 }
 0x1e0   :  { %3668 = vmatpush1.bf16.msra.mxu0 %v4892_v46  ;;  %3832 = vmatpush1.bf16.msra.mxu1 %v4894_v53  ;;  %v415_v46 = vld [vmem:[#allocation5 + $0xa50] sm:$0xff] }
 0x1e1   :  { %3669 = vmatprep.subr.bf16.mxu0 %v4901_v47  ;;  %3833 = vmatprep.subr.bf16.mxu1 %v4903_v48  ;;  %v419_v53 = vld [vmem:[#allocation5 + $0xa70] sm:$0xff]  ;;  %v416_v47 = vld [vmem:[#allocation5 + $0xa58] sm:$0xff] }
 0x1e2   :  { %3699 = vmatprep.mubr.bf16.mxu0 %v5705_v63  ;;  %3863 = vmatprep.mubr.bf16.mxu1 %v5705_v63  ;;  %v4927_v63 = vcombine.high %v376_v4, %v380_v5  ;;  %v420_v48 = vld [vmem:[#allocation5 + $0xa78] sm:$0xff]  ;;  %v4965_v50 = vcombine.high %v415_v46, %v419_v53  ;;  %v4964_v57 = vcombine.low %v415_v46, %v419_v53 }
 0x1e3   :  { %v4967_v51 = vcombine.high %v416_v47, %v420_v48  ;;  %v4966_v58 = vcombine.low %v416_v47, %v420_v48 }
 0x1e4   :  { %3670 = vmatpush1.bf16.msra.mxu0 %v4900_v52  ;;  %3834 = vmatpush1.bf16.msra.mxu1 %v4902_v54  ;;  %v423_v52 = vld [vmem:[#allocation5 + $0xa90] sm:$0xff] }
 0x1e5   :  { %3671 = vmatprep.subr.bf16.mxu0 %v4909_v55  ;;  %3835 = vmatprep.subr.bf16.mxu1 %v4911_v56  ;;  %v427_v54 = vld [vmem:[#allocation5 + $0xab0] sm:$0xff]  ;;  %v424_v55 = vld [vmem:[#allocation5 + $0xa98] sm:$0xff] }
 0x1e6   :  { %v428_v56 = vld [vmem:[#allocation5 + $0xab8] sm:$0xff]  ;;  %v4973_v60 = vcombine.high %v423_v52, %v427_v54  ;;  %v4972_v1 = vcombine.low %v423_v52, %v427_v54 }
 0x1e7   :  { %v4975_v36 = vcombine.high %v424_v55, %v428_v56  ;;  %v4974_v3 = vcombine.low %v424_v55, %v428_v56 }
 0x1e8   :  { %3672 = vmatpush1.bf16.msra.mxu0 %v4908_v61  ;;  %3836 = vmatpush1.bf16.msra.mxu1 %v4910_v42  ;;  %v431_v61 = vld [vmem:[#allocation5 + $0xad0] sm:$0xff] }
 0x1e9   :  { %3673 = vmatprep.subr.bf16.mxu0 %v4917_v62  ;;  %3837 = vmatprep.subr.bf16.mxu1 %v4919_v0  ;;  %v435_v42 = vld [vmem:[#allocation5 + $0xaf0] sm:$0xff]  ;;  %v432_v62 = vld [vmem:[#allocation5 + $0xad8] sm:$0xff] }
 0x1ea   :  { %v436_v0 = vld [vmem:[#allocation5 + $0xaf8] sm:$0xff]  ;;  %v4981_v4 = vcombine.high %v431_v61, %v435_v42  ;;  %v4980_v10 = vcombine.low %v431_v61, %v435_v42 }
 0x1eb   :  { %v4983_v5 = vcombine.high %v432_v62, %v436_v0  ;;  %v4982_v11 = vcombine.low %v432_v62, %v436_v0 }
 0x1ec   :  { %3674 = vmatpush1.bf16.msra.mxu0 %v4916_v6  ;;  %3838 = vmatpush1.bf16.msra.mxu1 %v4918_v7  ;;  %v439_v6 = vld [vmem:[#allocation5 + $0xb10] sm:$0xff] }
 0x1ed   :  { %3675 = vmatprep.subr.bf16.mxu0 %v4925_v8  ;;  %3839 = vmatprep.subr.bf16.mxu1 %v4927_v63  ;;  %v443_v7 = vld [vmem:[#allocation5 + $0xb30] sm:$0xff]  ;;  %v440_v8 = vld [vmem:[#allocation5 + $0xb18] sm:$0xff] }
 0x1ee   :  { %v444_v63 = vld [vmem:[#allocation5 + $0xb38] sm:$0xff]  ;;  %v4989_v13 = vcombine.high %v439_v6, %v443_v7  ;;  %v4988_v19 = vcombine.low %v439_v6, %v443_v7 }
 0x1ef   :  { %v4991_v14 = vcombine.high %v440_v8, %v444_v63  ;;  %v4990_v20 = vcombine.low %v440_v8, %v444_v63  ;;  %v503_v63 = vld [vmem:[#allocation5 + $0xd10] sm:$0xff] }
 0x1f0   :  { %3676 = vmatpush1.bf16.msra.mxu0 %v4924_v15  ;;  %3840 = vmatpush1.bf16.msra.mxu1 %v4926_v16  ;;  %v447_v15 = vld [vmem:[#allocation5 + $0xb50] sm:$0xff] }
 0x1f1   :  { %3677 = vmatprep.subr.bf16.mxu0 %v4933_v17  ;;  %3841 = vmatprep.subr.bf16.mxu1 %v4935_v18  ;;  %v451_v16 = vld [vmem:[#allocation5 + $0xb70] sm:$0xff]  ;;  %v448_v17 = vld [vmem:[#allocation5 + $0xb58] sm:$0xff] }
 0x1f2   :  { %v452_v18 = vld [vmem:[#allocation5 + $0xb78] sm:$0xff]  ;;  %v4997_v21 = vcombine.high %v447_v15, %v451_v16  ;;  %v4996_v28 = vcombine.low %v447_v15, %v451_v16 }
 0x1f3   :  { %v4999_v22 = vcombine.high %v448_v17, %v452_v18  ;;  %v4998_v29 = vcombine.low %v448_v17, %v452_v18  ;;  %v511_v17 = vld [vmem:[#allocation5 + $0xd50] sm:$0xff] }
 0x1f4   :  { %3678 = vmatpush1.bf16.msra.mxu0 %v4932_v23  ;;  %3842 = vmatpush1.bf16.msra.mxu1 %v4934_v24  ;;  %v455_v23 = vld [vmem:[#allocation5 + $0xb90] sm:$0xff] }
 0x1f5   :  { %3679 = vmatprep.subr.bf16.mxu0 %v4941_v26  ;;  %3843 = vmatprep.subr.bf16.mxu1 %v4943_v27  ;;  %v459_v24 = vld [vmem:[#allocation5 + $0xbb0] sm:$0xff]  ;;  %v456_v26 = vld [vmem:[#allocation5 + $0xb98] sm:$0xff] }
 0x1f6   :  { %v460_v27 = vld [vmem:[#allocation5 + $0xbb8] sm:$0xff]  ;;  %v5005_v59 = vcombine.high %v455_v23, %v459_v24  ;;  %v5004_v35 = vcombine.low %v455_v23, %v459_v24  ;;  %v515_v18 = vld [vmem:[#allocation5 + $0xd70] sm:$0xff] }
 0x1f7   :  { %v5007_v30 = vcombine.high %v456_v26, %v460_v27  ;;  %v5006_v38 = vcombine.low %v456_v26, %v460_v27  ;;  %v5061_v23 = vcombine.high %v511_v17, %v515_v18  ;;  %v519_v26 = vld [vmem:[#allocation5 + $0xd90] sm:$0xff] }
 0x1f8   :  { %3680 = vmatpush1.bf16.msra.mxu0 %v4940_v31  ;;  %3844 = vmatpush1.bf16.msra.mxu1 %v4942_v32  ;;  %v463_v31 = vld [vmem:[#allocation5 + $0xbd0] sm:$0xff] }
 0x1f9   :  { %3681 = vmatprep.subr.bf16.mxu0 %v4949_v33  ;;  %3845 = vmatprep.subr.bf16.mxu1 %v4951_v34  ;;  %v467_v32 = vld [vmem:[#allocation5 + $0xbf0] sm:$0xff]  ;;  %v464_v33 = vld [vmem:[#allocation5 + $0xbd8] sm:$0xff] }
 0x1fa   :  { %v468_v34 = vld [vmem:[#allocation5 + $0xbf8] sm:$0xff]  ;;  %v5013_v39 = vcombine.high %v463_v31, %v467_v32  ;;  %v5012_v46 = vcombine.low %v463_v31, %v467_v32  ;;  %v523_v27 = vld [vmem:[#allocation5 + $0xdb0] sm:$0xff] }
 0x1fb   :  { %v5015_v40 = vcombine.high %v464_v33, %v468_v34  ;;  %v5014_v53 = vcombine.low %v464_v33, %v468_v34  ;;  %v5069_v31 = vcombine.high %v519_v26, %v523_v27  ;;  %v527_v34 = vld [vmem:[#allocation5 + $0xdd0] sm:$0xff] }
 0x1fc   :  { %3682 = vmatpush1.bf16.msra.mxu0 %v4948_v41  ;;  %3846 = vmatpush1.bf16.msra.mxu1 %v4950_v44  ;;  %v471_v41 = vld [vmem:[#allocation5 + $0xc10] sm:$0xff] }
 0x1fd   :  { %3683 = vmatprep.subr.bf16.mxu0 %v4957_v45  ;;  %3847 = vmatprep.subr.bf16.mxu1 %v4959_v9  ;;  %v475_v44 = vld [vmem:[#allocation5 + $0xc30] sm:$0xff]  ;;  %v472_v45 = vld [vmem:[#allocation5 + $0xc18] sm:$0xff] }
 0x1fe   :  { %v476_v9 = vld [vmem:[#allocation5 + $0xc38] sm:$0xff]  ;;  %v5021_v47 = vcombine.high %v471_v41, %v475_v44  ;;  %v5020_v52 = vcombine.low %v471_v41, %v475_v44 }
 0x1ff   :  { %v5023_v48 = vcombine.high %v472_v45, %v476_v9  ;;  %v5022_v54 = vcombine.low %v472_v45, %v476_v9  ;;  %v532_v41 = vld [vmem:[#allocation5 + $0xdf8] sm:$0xff]  ;;  %v5068_v9 = vcombine.low %v519_v26, %v523_v27 }
 0x200   :  { %3684 = vmatpush1.bf16.msra.mxu0 %v4956_v49  ;;  %3848 = vmatpush1.bf16.msra.mxu1 %v4958_v25  ;;  %v479_v49 = vld [vmem:[#allocation5 + $0xc50] sm:$0xff] }
 0x201   :  { %3685 = vmatprep.subr.bf16.mxu0 %v4965_v50  ;;  %3849 = vmatprep.subr.bf16.mxu1 %v4967_v51  ;;  %v483_v25 = vld [vmem:[#allocation5 + $0xc70] sm:$0xff]  ;;  %v480_v50 = vld [vmem:[#allocation5 + $0xc58] sm:$0xff] }
 0x202   :  { %v484_v51 = vld [vmem:[#allocation5 + $0xc78] sm:$0xff]  ;;  %v5029_v55 = vcombine.high %v479_v49, %v483_v25  ;;  %v5028_v61 = vcombine.low %v479_v49, %v483_v25 }
 0x203   :  { %v5031_v56 = vcombine.high %v480_v50, %v484_v51  ;;  %v5030_v42 = vcombine.low %v480_v50, %v484_v51  ;;  %v535_v50 = vld [vmem:[#allocation5 + $0xe10] sm:$0xff] }
 0x204   :  { %3686 = vmatpush1.bf16.msra.mxu0 %v4964_v57  ;;  %3850 = vmatpush1.bf16.msra.mxu1 %v4966_v58  ;;  %v487_v57 = vld [vmem:[#allocation5 + $0xc90] sm:$0xff] }
 0x205   :  { %3687 = vmatprep.subr.bf16.mxu0 %v4973_v60  ;;  %3851 = vmatprep.subr.bf16.mxu1 %v4975_v36  ;;  %v491_v58 = vld [vmem:[#allocation5 + $0xcb0] sm:$0xff]  ;;  %v488_v60 = vld [vmem:[#allocation5 + $0xc98] sm:$0xff] }
 0x206   :  { %v492_v36 = vld [vmem:[#allocation5 + $0xcb8] sm:$0xff]  ;;  %v5037_v62 = vcombine.high %v487_v57, %v491_v58  ;;  %v5036_v6 = vcombine.low %v487_v57, %v491_v58  ;;  %v539_v51 = vld [vmem:[#allocation5 + $0xe30] sm:$0xff] }
 0x207   :  { %v5039_v0 = vcombine.high %v488_v60, %v492_v36  ;;  %v5085_v57 = vcombine.high %v535_v50, %v539_v51 }
 0x208   :  { %3688 = vmatpush1.bf16.msra.mxu0 %v4972_v1  ;;  %3852 = vmatpush1.bf16.msra.mxu1 %v4974_v3  ;;  %v495_v1 = vld [vmem:[#allocation5 + $0xcd0] sm:$0xff] }
 0x209   :  { %3689 = vmatprep.subr.bf16.mxu0 %v4981_v4  ;;  %3853 = vmatprep.subr.bf16.mxu1 %v4983_v5  ;;  %v499_v3 = vld [vmem:[#allocation5 + $0xcf0] sm:$0xff]  ;;  %v496_v4 = vld [vmem:[#allocation5 + $0xcd8] sm:$0xff] }
 0x20a   :  { %v500_v5 = vld [vmem:[#allocation5 + $0xcf8] sm:$0xff]  ;;  %v5045_v7 = vcombine.high %v495_v1, %v499_v3 }
 0x20b   :  { %v5047_v8 = vcombine.high %v496_v4, %v500_v5  ;;  %v5046_v15 = vcombine.low %v496_v4, %v500_v5  ;;  %v551_v4 = vld [vmem:[#allocation5 + $0xe90] sm:$0xff] }
 0x20c   :  { %3690 = vmatpush1.bf16.msra.mxu0 %v4980_v10  ;;  %3854 = vmatpush1.bf16.msra.mxu1 %v4982_v11  ;;  %v507_v10 = vld [vmem:[#allocation5 + $0xd30] sm:$0xff]  ;;  %v504_v11 = vld [vmem:[#allocation5 + $0xd18] sm:$0xff] }
 0x20d   :  { %3691 = vmatprep.subr.bf16.mxu0 %v4989_v13  ;;  %3855 = vmatprep.subr.bf16.mxu1 %v4991_v14  ;;  %v508_v13 = vld [vmem:[#allocation5 + $0xd38] sm:$0xff]  ;;  %v5044_v14 = vcombine.low %v495_v1, %v499_v3  ;;  %v5053_v16 = vcombine.high %v503_v63, %v507_v10  ;;  %v555_v5 = vld [vmem:[#allocation5 + $0xeb0] sm:$0xff] }
 0x210   :  { %3692 = vmatpush1.bf16.msra.mxu0 %v4988_v19  ;;  %3856 = vmatpush1.bf16.msra.mxu1 %v4990_v20  ;;  %v512_v19 = vld [vmem:[#allocation5 + $0xd58] sm:$0xff] }
 0x211   :  { %3693 = vmatprep.subr.bf16.mxu0 %v4997_v21  ;;  %3857 = vmatprep.subr.bf16.mxu1 %v4999_v22  ;;  %v516_v20 = vld [vmem:[#allocation5 + $0xd78] sm:$0xff]  ;;  %v5052_v21 = vcombine.low %v503_v63, %v507_v10  ;;  %v5054_v22 = vcombine.low %v504_v11, %v508_v13  ;;  %v5101_v63 = vcombine.high %v551_v4, %v555_v5 }
 0x212   :  { %v5063_v24 = vcombine.high %v512_v19, %v516_v20 }
 0x214   :  { %3694 = vmatpush1.bf16.msra.mxu0 %v4996_v28  ;;  %3858 = vmatpush1.bf16.msra.mxu1 %v4998_v29  ;;  %v520_v28 = vld [vmem:[#allocation5 + $0xd98] sm:$0xff] }
 0x215   :  { %3695 = vmatprep.subr.bf16.mxu0 %v5005_v59  ;;  %3859 = vmatprep.subr.bf16.mxu1 %v5007_v30  ;;  %v524_v29 = vld [vmem:[#allocation5 + $0xdb8] sm:$0xff]  ;;  %v5060_v59 = vcombine.low %v511_v17, %v515_v18  ;;  %v5062_v30 = vcombine.low %v512_v19, %v516_v20  ;;  %v567_v19 = vld [vmem:[#allocation5 + $0xf10] sm:$0xff] }
 0x216   :  { %v5071_v33 = vcombine.high %v520_v28, %v524_v29  ;;  %v571_v20 = vld [vmem:[#allocation5 + $0xf30] sm:$0xff] }
 0x217   :  { %v5117_v26 = vcombine.high %v567_v19, %v571_v20 }
 0x218   :  { %3696 = vmatpush1.bf16.msra.mxu0 %v5004_v35  ;;  %3860 = vmatpush1.bf16.msra.mxu1 %v5006_v38  ;;  %v531_v35 = vld [vmem:[#allocation5 + $0xdf0] sm:$0xff] }
 0x219   :  { %3697 = vmatprep.subr.bf16.mxu0 %v5013_v39  ;;  %3861 = vmatprep.subr.bf16.mxu1 %v5015_v40  ;;  %v528_v40 = vld [vmem:[#allocation5 + $0xdd8] sm:$0xff] }
 0x21a   :  { %v5079_v25 = vcombine.high %v528_v40, %v532_v41 }
 0x21c   :  { %3698 = vmatpush1.bf16.msra.mxu0 %v5012_v46  ;;  %3862 = vmatpush1.bf16.msra.mxu1 %v5014_v53 }
 0x21d   :  { %3708 = vmatprep.subr.bf16.mxu0 %v5021_v47  ;;  %3872 = vmatprep.subr.bf16.mxu1 %v5023_v48  ;;  %v5070_v47 = vcombine.low %v520_v28, %v524_v29  ;;  %v5077_v48 = vcombine.high %v527_v34, %v531_v35  ;;  %v575_v28 = vld [vmem:[#allocation5 + $0xf50] sm:$0xff] }
 0x21e   :  { %v579_v29 = vld [vmem:[#allocation5 + $0xf70] sm:$0xff] }
 0x21f   :  { %3700 = vmatmul.mubr.bf16.vlgmr.msra.gmra.mrb[4].mxu0 %v5708_v37  ;;  %3864 = vmatmul.mubr.bf16.vlgmr.msra.gmra.mrb[4].mxu1 %v5708_v37  ;;  %v5038_v37 = vcombine.low %v488_v60, %v492_v36  ;;  %v543_v60 = vld [vmem:[#allocation5 + $0xe50] sm:$0xff] }
 0x220   :  { %3709 = vmatpush1.bf16.msra.mxu0 %v5020_v52  ;;  %3873 = vmatpush1.bf16.msra.mxu1 %v5022_v54  ;;  %v536_v52 = vld [vmem:[#allocation5 + $0xe18] sm:$0xff]  ;;  %v547_v36 = vld [vmem:[#allocation5 + $0xe70] sm:$0xff] }
 0x221   :  { %3710 = vmatprep.subr.bf16.mxu0 %v5029_v55  ;;  %3874 = vmatprep.subr.bf16.mxu1 %v5031_v56  ;;  %v540_v54 = vld [vmem:[#allocation5 + $0xe38] sm:$0xff]  ;;  %v5076_v55 = vcombine.low %v527_v34, %v531_v35  ;;  %v5078_v56 = vcombine.low %v528_v40, %v532_v41  ;;  %v5093_v1 = vcombine.high %v543_v60, %v547_v36  ;;  %v583_v40 = vld [vmem:[#allocation5 + $0xf90] sm:$0xff] }
 0x222   :  { %3740 = vmatprep.mubr.bf16.mxu0 %v5724_v2  ;;  %3904 = vmatprep.mubr.bf16.mxu1 %v5724_v2  ;;  %v5055_v2 = vcombine.high %v504_v11, %v508_v13  ;;  %v5087_v58 = vcombine.high %v536_v52, %v540_v54  ;;  %v559_v11 = vld [vmem:[#allocation5 + $0xed0] sm:$0xff]  ;;  %v5125_v34 = vcombine.high %v575_v28, %v579_v29 }
 0x223   :  { %v563_v13 = vld [vmem:[#allocation5 + $0xef0] sm:$0xff] }
 0x224   :  { %3711 = vmatpush1.bf16.msra.mxu0 %v5028_v61  ;;  %3875 = vmatpush1.bf16.msra.mxu1 %v5030_v42  ;;  %v544_v61 = vld [vmem:[#allocation5 + $0xe58] sm:$0xff]  ;;  %v5109_v17 = vcombine.high %v559_v11, %v563_v13  ;;  %v587_v41 = vld [vmem:[#allocation5 + $0xfb0] sm:$0xff] }
 0x225   :  { %3712 = vmatprep.subr.bf16.mxu0 %v5037_v62  ;;  %3876 = vmatprep.subr.bf16.mxu1 %v5039_v0  ;;  %v548_v42 = vld [vmem:[#allocation5 + $0xe78] sm:$0xff]  ;;  %v5084_v62 = vcombine.low %v535_v50, %v539_v51  ;;  %v5086_v0 = vcombine.low %v536_v52, %v540_v54  ;;  %v591_v51 = vld [vmem:[#allocation5 + $0xfd0] sm:$0xff] }
 0x226   :  { %v5095_v3 = vcombine.high %v544_v61, %v548_v42  ;;  %v595_v52 = vld [vmem:[#allocation5 + $0xff0] sm:$0xff] }
 0x228   :  { %3713 = vmatpush1.bf16.msra.mxu0 %v5036_v6  ;;  %3877 = vmatpush1.bf16.msra.mxu1 %v5038_v37  ;;  %v552_v6 = vld [vmem:[#allocation5 + $0xe98] sm:$0xff] }
 0x229   :  { %3714 = vmatprep.subr.bf16.mxu0 %v5045_v7  ;;  %3878 = vmatprep.subr.bf16.mxu1 %v5047_v8  ;;  %v556_v37 = vld [vmem:[#allocation5 + $0xeb8] sm:$0xff]  ;;  %v5092_v7 = vcombine.low %v543_v60, %v547_v36  ;;  %v5094_v8 = vcombine.low %v544_v61, %v548_v42  ;;  %v5141_v36 = vcombine.high %v591_v51, %v595_v52 }
 0x22a   :  { %v5103_v10 = vcombine.high %v552_v6, %v556_v37 }
 0x22c   :  { %3715 = vmatpush1.bf16.msra.mxu0 %v5044_v14  ;;  %3879 = vmatpush1.bf16.msra.mxu1 %v5046_v15  ;;  %v560_v14 = vld [vmem:[#allocation5 + $0xed8] sm:$0xff] }
 0x22d   :  { %3716 = vmatprep.subr.bf16.mxu0 %v5053_v16  ;;  %3880 = vmatprep.subr.bf16.mxu1 %v5055_v2  ;;  %v564_v15 = vld [vmem:[#allocation5 + $0xef8] sm:$0xff]  ;;  %v5100_v16 = vcombine.low %v551_v4, %v555_v5  ;;  %v5102_v2 = vcombine.low %v552_v6, %v556_v37  ;;  %v5367_v4 = vld [vmem:[#allocation8 + $0xc0] sm:$0xff]  }
 0x22e   :  { %v5111_v18 = vcombine.high %v560_v14, %v564_v15  ;;  %v5368_v37 = vld [vmem:[#allocation8] sm:$0xff]  }
 0x230   :  { %3717 = vmatpush1.bf16.msra.mxu0 %v5052_v21  ;;  %3881 = vmatpush1.bf16.msra.mxu1 %v5054_v22  ;;  %v568_v21 = vld [vmem:[#allocation5 + $0xf18] sm:$0xff] }
 0x231   :  { %3718 = vmatprep.subr.bf16.mxu0 %v5061_v23  ;;  %3882 = vmatprep.subr.bf16.mxu1 %v5063_v24  ;;  %v572_v22 = vld [vmem:[#allocation5 + $0xf38] sm:$0xff]  ;;  %v5108_v23 = vcombine.low %v559_v11, %v563_v13  ;;  %v5110_v24 = vcombine.low %v560_v14, %v564_v15  ;;  %v5373_v11 = vld [vmem:[#allocation8 + $0x88] sm:$0xff]  }
 0x232   :  { %v5750_v32 = vpop.f32.mrb[0].mxu0  ;;  %v5752_v38 = vpop.f32.mrb[0].mxu1  ;;  %v5119_v27 = vcombine.high %v568_v21, %v572_v22  ;;  %v5374_v13 = vld [vmem:[#allocation8 + $0x50] sm:$0xff]  }
 0x233   :  { %v5754_v39 = vpop.f32.mrb[1].mxu0  ;;  %v5756_v44 = vpop.f32.mrb[1].mxu1  ;;  %v5375_v14 = vld [vmem:[#allocation8 + $0xd0] sm:$0xff]  }
 0x234   :  { %v3418_v45 = vpop.f32.mrb[2].mxu0  ;;  %3719 = vmatpush1.bf16.msra.mxu0 %v5060_v59  ;;  %v3582_v46 = vpop.f32.mrb[2].mxu1  ;;  %3883 = vmatpush1.bf16.msra.mxu1 %v5062_v30  ;;  %v576_v59 = vld [vmem:[#allocation5 + $0xf58] sm:$0xff] }
 0x235   :  { %v3419_v53 = vpop.f32.mrb[3].mxu0  ;;  %3720 = vmatprep.subr.bf16.mxu0 %v5069_v31  ;;  %v3583_v49 = vpop.f32.mrb[3].mxu1  ;;  %3884 = vmatprep.subr.bf16.mxu1 %v5071_v33  ;;  %v580_v30 = vld [vmem:[#allocation5 + $0xf78] sm:$0xff]  ;;  %v5116_v31 = vcombine.low %v567_v19, %v571_v20  ;;  %v5118_v33 = vcombine.low %v568_v21, %v572_v22  ;;  %v605_v45 = vsub.s32 1, %v5675_v43  ;;  %v5382_v19 = vld [vmem:[#allocation8 + $0x60] sm:$0xff]   ;;  %v601_v22 = vsub.s32 0, %v5675_v43 }
 0x236   :  { %v5127_v35 = vcombine.high %v576_v59, %v580_v30  ;;  %v588_v46 = vld [vmem:[#allocation5 + $0xfb8] sm:$0xff]  ;;  %v5759_v53 = vld [vmem:[#allocation7] sm:$0xff]  ;;  %v5126_v49 = vcombine.low %v576_v59, %v580_v30  ;;  %v5383_v20 = vld [vmem:[#allocation8 + $0xe0] sm:$0xff]  }
 0x237   :  { %v606_v54 = vrot.slane %v5759_v53, %v605_v45  ;;  %v5376_v15 = vld [vmem:[#allocation8 + $0x10] sm:$0xff]   ;;  %v5384_v21 = vld [vmem:[#allocation8 + $0x20] sm:$0xff]   ;;  %v5389_v59 = vld [vmem:[#allocation8 + $0xa8] sm:$0xff]  }
 0x238   :  { %3721 = vmatpush1.bf16.msra.mxu0 %v5068_v9  ;;  %3885 = vmatpush1.bf16.msra.mxu1 %v5070_v47  ;;  %v584_v9 = vld [vmem:[#allocation5 + $0xf98] sm:$0xff]  ;;  %v613_v47 = vsub.s32 3, %v5675_v43 }
 0x239   :  { %3722 = vmatprep.subr.bf16.mxu0 %v5077_v48  ;;  %3886 = vmatprep.subr.bf16.mxu1 %v5079_v25  ;;  %v5124_v48 = vcombine.low %v575_v28, %v579_v29  ;;  %v5133_v25 = vcombine.high %v583_v40, %v587_v41  ;;  %v5135_v50 = vcombine.high %v584_v9, %v588_v46  ;;  %v5388_v28 = vld [vmem:[#allocation8 + $0x28] sm:$0xff]   ;;  %v5390_v30 = vld [vmem:[#allocation8 + $0x70] sm:$0xff]  }
 0x23a   :  { %v5134_v60 = vcombine.low %v584_v9, %v588_v46  ;;  %v5299_v42 = vadd.f32 %v5754_v39, %v606_v54  ;;  %v602_v29 = vrot.slane %v5759_v53, %v601_v22  ;;  %v5395_v9 = vld [vmem:[#allocation8 + $0xf8] sm:$0xff]   ;;  %v5402_v54 = vld [vmem:[#allocation8 + $0x148] sm:$0xff]  }
 0x23b   :  { %v5396_v46 = vld [vmem:[#allocation8 + $0x38] sm:$0xff]  }
 0x23c   :  { %3723 = vmatpush1.bf16.msra.mxu0 %v5076_v55  ;;  %3887 = vmatpush1.bf16.msra.mxu1 %v5078_v56  ;;  %v592_v55 = vld [vmem:[#allocation5 + $0xfd8] sm:$0xff]  ;;  %v3914_v5 = vmax.f32 %v5299_v42, 0.0  ;;  %v5410_v42 = vld [vmem:[#allocation8 + $0x158] sm:$0xff]  }
 0x23d   :  { %3724 = vmatprep.subr.bf16.mxu0 %v5085_v57  ;;  %3888 = vmatprep.subr.bf16.mxu1 %v5087_v58  ;;  %v596_v56 = vld [vmem:[#allocation5 + $0xff8] sm:$0xff]  ;;  %v614_v57 = vrot.slane %v5759_v53, %v613_v47  ;;  %v5132_v58 = vcombine.low %v583_v40, %v587_v41  ;;  %v5394_v41 = vld [vmem:[#allocation8 + $0x78] sm:$0xff]  }
 0x23e   :  { %v5143_v61 = vcombine.high %v592_v55, %v596_v56  ;;  %v3922_v39 = vpack.c.bf16 %v3914_v5, %v3914_v5  ;;  %v5393_v40 = vld [vmem:[#allocation8 + $0xb0] sm:$0xff]   ;;  %v5416_v5 = vld [vmem:[#allocation8 + $0x120] sm:$0xff]  }
 0x240   :  { %3725 = vmatpush1.bf16.msra.mxu0 %v5084_v62  ;;  %3889 = vmatpush1.bf16.msra.mxu1 %v5086_v0  ;;  %v5301_v62 = vadd.f32 %v5756_v44, %v614_v57  ;;  %v5140_v0 = vcombine.low %v591_v51, %v595_v52  ;;  %v5371_v44 = vld [vmem:[#allocation8 + $0xc8] sm:$0xff]   ;;  %v5401_v52 = vld [vmem:[#allocation8 + $0x180] sm:$0xff]  }
 0x241   :  { %3726 = vmatprep.subr.bf16.mxu0 %v5093_v1  ;;  %3890 = vmatprep.subr.bf16.mxu1 %v5095_v3  ;;  %v5142_v1 = vcombine.low %v592_v55, %v596_v56  ;;  %v5366_v3 = vld [vmem:[#allocation8 + $0x40] sm:$0xff]   ;;  %v5403_v55 = vld [vmem:[#allocation8 + $0x1c8] sm:$0xff]  }
 0x242   :  { %v3916_v6 = vmax.f32 %v5301_v62, 0.0  ;;  %v5404_v56 = vld [vmem:[#allocation8 + $0x108] sm:$0xff]   ;;  %v5411_v62 = vld [vmem:[#allocation8 + $0x1d8] sm:$0xff]  }
 0x243   :  { %v5405_v57 = vld [vmem:[#allocation8 + $0x188] sm:$0xff]  }
 0x244   :  { %3727 = vmatpush1.bf16.msra.mxu0 %v5092_v7  ;;  %3891 = vmatpush1.bf16.msra.mxu1 %v5094_v8  ;;  %v5369_v7 = vld [vmem:[#allocation8 + $0x80] sm:$0xff]   ;;  %v5370_v8 = vld [vmem:[#allocation8 + $0x48] sm:$0xff]  }
 0x245   :  { %3728 = vmatprep.subr.bf16.mxu0 %v5101_v63  ;;  %3892 = vmatprep.subr.bf16.mxu1 %v5103_v10  ;;  %v3924_v63 = vpack.c.bf16 %v3916_v6, %v3916_v6  ;;  %v5372_v10 = vld [vmem:[#allocation8 + $0x8] sm:$0xff]   ;;  %v5417_v6 = vld [vmem:[#allocation8 + $0x1a0] sm:$0xff]  }
 0x248   :  { %3729 = vmatpush1.bf16.msra.mxu0 %v5100_v16  ;;  %3893 = vmatpush1.bf16.msra.mxu1 %v5102_v2  ;;  %v5377_v16 = vld [vmem:[#allocation8 + $0x90] sm:$0xff]   ;;  %v5378_v2 = vld [vmem:[#allocation8 + $0x58] sm:$0xff]  }
 0x249   :  { %3730 = vmatprep.subr.bf16.mxu0 %v5109_v17  ;;  %3894 = vmatprep.subr.bf16.mxu1 %v5111_v18  ;;  %v5379_v17 = vld [vmem:[#allocation8 + $0xd8] sm:$0xff]  }
 0x24a   :  { %v5381_v18 = vld [vmem:[#allocation8 + $0x98] sm:$0xff]  }
 0x24c   :  { %3731 = vmatpush1.bf16.msra.mxu0 %v5108_v23  ;;  %3895 = vmatpush1.bf16.msra.mxu1 %v5110_v24  ;;  %v5385_v23 = vld [vmem:[#allocation8 + $0xa0] sm:$0xff]   ;;  %v5386_v24 = vld [vmem:[#allocation8 + $0x68] sm:$0xff]  }
 0x24d   :  { %3732 = vmatprep.subr.bf16.mxu0 %v5117_v26  ;;  %3896 = vmatprep.subr.bf16.mxu1 %v5119_v27  ;;  %v609_v26 = vsub.s32 2, %v5675_v43  ;;  %v5387_v27 = vld [vmem:[#allocation8 + $0xe8] sm:$0xff]  }
 0x250   :  { %3733 = vmatpush1.bf16.msra.mxu0 %v5116_v31  ;;  %3897 = vmatpush1.bf16.msra.mxu1 %v5118_v33  ;;  %v610_v31 = vrot.slane %v5759_v53, %v609_v26  ;;  %v5391_v33 = vld [vmem:[#allocation8 + $0xf0] sm:$0xff]  }
 0x251   :  { %3734 = vmatprep.subr.bf16.mxu0 %v5125_v34  ;;  %3898 = vmatprep.subr.bf16.mxu1 %v5127_v35  ;;  %v5392_v34 = vld [vmem:[#allocation8 + $0x30] sm:$0xff]   ;;  %v5298_v35 = vadd.f32 %v5750_v32, %v602_v29  ;;  %v5400_v32 = vld [vmem:[#allocation8 + $0x100] sm:$0xff]  }
 0x252   :  { %v5300_v45 = vadd.f32 %v5752_v38, %v610_v31 }
 0x253   :  { %v3913_v47 = vmax.f32 %v5298_v35, 0.0 }
 0x254   :  { %3735 = vmatpush1.bf16.msra.mxu0 %v5124_v48  ;;  %3899 = vmatpush1.bf16.msra.mxu1 %v5126_v49  ;;  %v5397_v48 = vld [vmem:[#allocation8 + $0xb8] sm:$0xff]   ;;  %v5398_v49 = vld [vmem:[#allocation8 + $0x140] sm:$0xff]  }
 0x255   :  { %3736 = vmatprep.subr.bf16.mxu0 %v5133_v25  ;;  %3900 = vmatprep.subr.bf16.mxu1 %v5135_v50  ;;  %v3915_v25 = vmax.f32 %v5300_v45, 0.0  ;;  %v5399_v50 = vld [vmem:[#allocation8 + $0x1c0] sm:$0xff]   ;;  %v3921_v51 = vpack.c.bf16 %v3913_v47, %v3913_v47 }
 0x257   :  { %v3923_v38 = vpack.c.bf16 %v3915_v25, %v3915_v25  ;;  %v5144_v25 = vld [vmem:[#allocation10] ss:$0 sm:$0xff] }
 0x258   :  { %3737 = vmatpush1.bf16.msra.mxu0 %v5132_v58  ;;  %3901 = vmatpush1.bf16.msra.mxu1 %v5134_v60  ;;  %v5406_v58 = vld [vmem:[#allocation8 + $0x150] sm:$0xff]  }
 0x259   :  { %3738 = vmatprep.subr.bf16.mxu0 %v5141_v36  ;;  %3902 = vmatprep.subr.bf16.mxu1 %v5143_v61  ;;  %v5407_v60 = vld [vmem:[#allocation8 + $0x1d0] sm:$0xff]  }
 0x25a   :  { %v5408_v36 = vld [vmem:[#allocation8 + $0x110] sm:$0xff]  }
 0x25b   :  { %v5409_v61 = vld [vmem:[#allocation8 + $0x190] sm:$0xff]  }
 0x25c   :  { %3739 = vmatpush1.bf16.msra.mxu0 %v5140_v0  ;;  %3903 = vmatpush1.bf16.msra.mxu1 %v5142_v1  ;;  %v5412_v0 = vld [vmem:[#allocation8 + $0x118] sm:$0xff]  }
 0x25d   :  { %5210 = vmatprep.subr.bf16.mxu0 %v5366_v3  ;;  %5232 = vmatprep.subr.bf16.mxu1 %v5367_v4  ;;  %v5413_v1 = vld [vmem:[#allocation8 + $0x198] sm:$0xff]   ;;  %v5414_v3 = vld [vmem:[#allocation8 + $0x160] sm:$0xff]  }
 0x25e   :  { %v5415_v4 = vld [vmem:[#allocation8 + $0x1e0] sm:$0xff]  }
 0x25f   :  { %3741 = vmatmul.mubr.bf16.vlgmr.msra.gmra.mrb[4].mxu0 %v5732_v12  ;;  %3905 = vmatmul.mubr.bf16.vlgmr.msra.gmra.mrb[4].mxu1 %v5732_v12  ;;  %v5380_v12 = vld [vmem:[#allocation8 + $0x18] sm:$0xff]  }
 0x260   :  { %5211 = vmatpush3.bf16.msra.mxu0 %v5368_v37  ;;  %4480 = vmatprep.mubr.bf16.mxu0 %v3922_v39  ;;  %v5418_v37 = vld [vmem:[#allocation8 + $0x168] sm:$0xff]  }
 0x261   :  { %5233 = vmatpush3.bf16.msra.mxu1 %v5369_v7  ;;  %4520 = vmatprep.mubr.bf16.mxu1 %v3924_v63  ;;  %v5419_v7 = vld [vmem:[#allocation8 + $0x1e8] sm:$0xff]   ;;  %v5423_v63 = vld [vmem:[#allocation8 + $0x1f0] sm:$0xff]  }
 0x262   :  { %5212 = vmatprep.subr.bf16.mxu0 %v5370_v8  ;;  %5234 = vmatprep.subr.bf16.mxu1 %v5371_v44  ;;  %v5420_v8 = vld [vmem:[#allocation8 + $0x128] sm:$0xff]   ;;  %v5422_v44 = vld [vmem:[#allocation8 + $0x170] sm:$0xff]  }
 0x263   :  { %v5421_v39 = vld [vmem:[#allocation8 + $0x1a8] sm:$0xff]  }
 0x264   :  { %5213 = vmatpush3.bf16.msra.mxu0 %v5372_v10  ;;  %v5424_v10 = vld [vmem:[#allocation8 + $0x130] sm:$0xff]  }
 0x265   :  { %5235 = vmatpush3.bf16.msra.mxu1 %v5373_v11  ;;  %5214 = vmatprep.subr.bf16.mxu0 %v5374_v13  ;;  %v5425_v11 = vld [vmem:[#allocation8 + $0x1b0] sm:$0xff]   ;;  %v5426_v13 = vld [vmem:[#allocation8 + $0x178] sm:$0xff]  }
 0x266   :  { %5236 = vmatprep.subr.bf16.mxu1 %v5375_v14  ;;  %v5427_v14 = vld [vmem:[#allocation8 + $0x1f8] sm:$0xff]  }
 0x268   :  { %5215 = vmatpush3.bf16.msra.mxu0 %v5376_v15  ;;  %v5428_v15 = vld [vmem:[#allocation8 + $0x138] sm:$0xff]  }
 0x269   :  { %5237 = vmatpush3.bf16.msra.mxu1 %v5377_v16  ;;  %5216 = vmatprep.subr.bf16.mxu0 %v5378_v2  ;;  %v5429_v16 = vld [vmem:[#allocation8 + $0x1b8] sm:$0xff]   ;;  %v617_v2 = vsub.s32 4, %v5675_v43 }
 0x26a   :  { %5238 = vmatprep.subr.bf16.mxu1 %v5379_v17  ;;  %v625_v17 = vsub.s32 6, %v5675_v43 }
 0x26c   :  { %5217 = vmatpush3.bf16.msra.mxu0 %v5380_v12  ;;  %v621_v12 = vsub.s32 5, %v5675_v43 }
 0x26d   :  { %5239 = vmatpush3.bf16.msra.mxu1 %v5381_v18  ;;  %5218 = vmatprep.subr.bf16.mxu0 %v5382_v19  ;;  %v629_v18 = vsub.s32 7, %v5675_v43  ;;  %v618_v19 = vrot.slane %v5759_v53, %v617_v2 }
 0x26e   :  { %5240 = vmatprep.subr.bf16.mxu1 %v5383_v20  ;;  %v626_v20 = vrot.slane %v5759_v53, %v625_v17 }
 0x26f   :  { %v630_v22 = vrot.slane %v5759_v53, %v629_v18 }
 0x270   :  { %5219 = vmatpush3.bf16.msra.mxu0 %v5384_v21  ;;  %v622_v21 = vrot.slane %v5759_v53, %v621_v12 }
 0x271   :  { %5241 = vmatpush3.bf16.msra.mxu1 %v5385_v23  ;;  %5220 = vmatprep.subr.bf16.mxu0 %v5386_v24 }
 0x272   :  { %5242 = vmatprep.subr.bf16.mxu1 %v5387_v27 }
 0x274   :  { %5221 = vmatpush3.bf16.msra.mxu0 %v5388_v28 }
 0x275   :  { %5243 = vmatpush3.bf16.msra.mxu1 %v5389_v59  ;;  %5222 = vmatprep.subr.bf16.mxu0 %v5390_v30 }
 0x276   :  { %5244 = vmatprep.subr.bf16.mxu1 %v5391_v33 }
 0x278   :  { %5223 = vmatpush3.bf16.msra.mxu0 %v5392_v34 }
 0x279   :  { %5245 = vmatpush3.bf16.msra.mxu1 %v5393_v40  ;;  %5224 = vmatprep.subr.bf16.mxu0 %v5394_v41 }
 0x27a   :  { %5246 = vmatprep.subr.bf16.mxu1 %v5395_v9 }
 0x27c   :  { %5225 = vmatpush3.bf16.msra.mxu0 %v5396_v46 }
 0x27d   :  { %5247 = vmatpush3.bf16.msra.mxu1 %v5397_v48  ;;  %5254 = vmatprep.subr.bf16.mxu0 %v5398_v49 }
 0x27e   :  { %5276 = vmatprep.subr.bf16.mxu1 %v5399_v50 }
 0x27f   :  { %4481 = vmatmul.mubr.bf16.vlgmr.msra.gmra.mrb[8].mxu0 %v3921_v51 }
 0x280   :  { %4521 = vmatmul.mubr.bf16.vlgmr.msra.gmra.mrb[8].mxu1 %v3923_v38  ;;  %5255 = vmatpush3.bf16.msra.mxu0 %v5400_v32 }
 0x281   :  { %5277 = vmatpush3.bf16.msra.mxu1 %v5401_v52  ;;  %5256 = vmatprep.subr.bf16.mxu0 %v5402_v54 }
 0x282   :  { %5278 = vmatprep.subr.bf16.mxu1 %v5403_v55 }
 0x284   :  { %5257 = vmatpush3.bf16.msra.mxu0 %v5404_v56 }
 0x285   :  { %5279 = vmatpush3.bf16.msra.mxu1 %v5405_v57  ;;  %5258 = vmatprep.subr.bf16.mxu0 %v5406_v58 }
 0x286   :  { %5280 = vmatprep.subr.bf16.mxu1 %v5407_v60 }
 0x288   :  { %5259 = vmatpush3.bf16.msra.mxu0 %v5408_v36 }
 0x289   :  { %5281 = vmatpush3.bf16.msra.mxu1 %v5409_v61  ;;  %5260 = vmatprep.subr.bf16.mxu0 %v5410_v42 }
 0x28a   :  { %5282 = vmatprep.subr.bf16.mxu1 %v5411_v62 }
 0x28c   :  { %5261 = vmatpush3.bf16.msra.mxu0 %v5412_v0 }
 0x28d   :  { %5283 = vmatpush3.bf16.msra.mxu1 %v5413_v1  ;;  %5262 = vmatprep.subr.bf16.mxu0 %v5414_v3 }
 0x28e   :  { %5284 = vmatprep.subr.bf16.mxu1 %v5415_v4 }
 0x290   :  { %5263 = vmatpush3.bf16.msra.mxu0 %v5416_v5 }
 0x291   :  { %5285 = vmatpush3.bf16.msra.mxu1 %v5417_v6  ;;  %5264 = vmatprep.subr.bf16.mxu0 %v5418_v37 }
 0x292   :  { %5286 = vmatprep.subr.bf16.mxu1 %v5419_v7 }
 0x294   :  { %5265 = vmatpush3.bf16.msra.mxu0 %v5420_v8 }
 0x295   :  { %5287 = vmatpush3.bf16.msra.mxu1 %v5421_v39  ;;  %5266 = vmatprep.subr.bf16.mxu0 %v5422_v44 }
 0x296   :  { %5288 = vmatprep.subr.bf16.mxu1 %v5423_v63 }
 0x298   :  { %5267 = vmatpush3.bf16.msra.mxu0 %v5424_v10 }
 0x299   :  { %5289 = vmatpush3.bf16.msra.mxu1 %v5425_v11  ;;  %5268 = vmatprep.subr.bf16.mxu0 %v5426_v13 }
 0x29a   :  { %5290 = vmatprep.subr.bf16.mxu1 %v5427_v14 }
 0x29c   :  { %5269 = vmatpush3.bf16.msra.mxu0 %v5428_v15 }
 0x29d   :  { %5291 = vmatpush3.bf16.msra.mxu1 %v5429_v16 }
 0x332   :  { %v3742_v23 = vpop.f32.mrb[4].mxu0  ;;  %v3906_v26 = vpop.f32.mrb[4].mxu1 }
 0x333   :  { %v5302_v24 = vadd.f32 %v3742_v23, %v618_v19  ;;  %v3744_v27 = vpop.f32.mrb[5].mxu0  ;;  %v5304_v28 = vadd.f32 %v3906_v26, %v626_v20  ;;  %v3908_v59 = vpop.f32.mrb[5].mxu1 }
 0x334   :  { %v5303_v29 = vadd.f32 %v3744_v27, %v622_v21  ;;  %v3746_v30 = vpop.f32.mrb[6].mxu0  ;;  %v5305_v33 = vadd.f32 %v3908_v59, %v630_v22  ;;  %v3910_v34 = vpop.f32.mrb[6].mxu1 }
 0x335   :  { %v3917_v31 = vmax.f32 %v5302_v24, 0.0  ;;  %v3747_v43 = vpop.f32.mrb[7].mxu0  ;;  %v3919_v35 = vmax.f32 %v5304_v28, 0.0  ;;  %v3911_v41 = vpop.f32.mrb[7].mxu1 }
 0x336   :  { %v3918_v40 = vmax.f32 %v5303_v29, 0.0  ;;  %v3920_v45 = vmax.f32 %v5305_v33, 0.0 }
 0x337   :  { %v3925_v46 = vpack.c.bf16 %v3917_v31, %v3917_v31  ;;  %v3927_v53 = vpack.c.bf16 %v3919_v35, %v3919_v35 }
 0x338   :  { %v3926_v9 = vpack.c.bf16 %v3918_v40, %v3918_v40  ;;  %v3928_v47 = vpack.c.bf16 %v3920_v45, %v3920_v45 }
 0x33a   :  { %4560 = vmatprep.mubr.bf16.mxu0 %v3926_v9  ;;  %4600 = vmatprep.mubr.bf16.mxu1 %v3928_v47 }
 0x33b   :  { %4561 = vmatmul.mubr.bf16.vlgmr.msra.gmra.mrb[12].mxu0 %v3925_v46  ;;  %4601 = vmatmul.mubr.bf16.vlgmr.msra.gmra.mrb[12].mxu1 %v3927_v53 }
 0x352   :  { %v5226_v48 = vpop.f32.mrb[8].mxu0 }
 0x353   :  { %v5248_v49 = vpop.f32.mrb[8].mxu1  ;;  %v5227_v50 = vpop.f32.mrb[9].mxu0 }
 0x354   :  { %v5228_v32 = vadd.f32 %v5227_v50, %v5226_v48  ;;  %v5249_v51 = vpop.f32.mrb[9].mxu1  ;;  %v5229_v52 = vpop.f32.mrb[10].mxu0 }
 0x355   :  { %v5250_v54 = vadd.f32 %v5249_v51, %v5248_v49  ;;  %v5251_v38 = vpop.f32.mrb[10].mxu1  ;;  %v5230_v55 = vpop.f32.mrb[11].mxu0 }
 0x356   :  { %v4483_v56 = vadd.f32 %v5228_v32, %v5144_v25  ;;  %v5252_v57 = vpop.f32.mrb[11].mxu1 }
 0x358   :  { %v4523_v58 = vadd.f32 %v5250_v54, %v4483_v56 }
 0x40e   :  { %v5270_v60 = vpop.f32.mrb[12].mxu0  ;;  %v5292_v36 = vpop.f32.mrb[12].mxu1 }
 0x40f   :  { %v5271_v61 = vpop.f32.mrb[13].mxu0  ;;  %v5293_v62 = vpop.f32.mrb[13].mxu1 }
 0x410   :  { %v5272_v42 = vadd.f32 %v5271_v61, %v5270_v60  ;;  %v5273_v0 = vpop.f32.mrb[14].mxu0  ;;  %v5294_v1 = vadd.f32 %v5293_v62, %v5292_v36  ;;  %v5295_v3 = vpop.f32.mrb[14].mxu1 }
 0x411   :  { %v5274_v4 = vpop.f32.mrb[15].mxu0  ;;  %v5296_v6 = vpop.f32.mrb[15].mxu1 }
 0x412   :  { %v4563_v5 = vadd.f32 %v5272_v42, %v4523_v58 }
 0x414   :  { %v4603_v37 = vadd.f32 %v5294_v1, %v4563_v5 }
 0x416   :  { %v5209_v7 = vmul.f32 -1.442695, %v4603_v37 }
 0x418   :  { %5430 = vpow2.f32 %v5209_v7 }
 0x422   :  { %v5431_v8 = vpop.eup %5430 }
 0x423   :  { %v4611_v39 = vadd.f32 1.0, %v5431_v8 }
 0x425   :  { %5432 = vrcp.f32 %v4611_v39 }
 0x42f   :  { %v5433_v44 = vpop.eup %5432 }
 0x430   :  { %4614 = vst [vmem:[#allocation11] sm:$0x3] %v5433_v44 }
 0x431   :  { %5555 = shalt.err (!%p5552_p2)
}
 0x432   :  { %s5556_s6 = scalar_lea.hbm %s5799_s5, 32 }
 0x433   :  { %p5557_p3 = scmp.ne.s32.totalorder %s5799_s5, %s5556_s6  ;;  %p5560_p4 = scmp.lt.u32.totalorder %s5556_s6, %s5799_s5 }
 0x435   :  { %p5562_p5 = pnand %p5560_p4, %p5557_p3 }
 0x437   :  { %5565 = shalt.err (!%p5562_p5)
}
 0x438   :  { %4624 = dma.vmem_to_hbm [thread:$0]  %s4622_s28, 32, %s5799_s5, [#allocation4]  }
 0x439   :  { %5572 = dma.done.wait [#allocation4], 32  }
 0x43a   :  { %5573 = vsyncadd [#allocation4], 4294967264 }
 0x43b   :  { %4628 = vsyncpa [#allocation3], 1 }
 0x43c   :  { %4629 = vsyncpa [#allocation6], 1 }
 0x43d   :  { %4630 = vsyncpa [#allocation9], 1 }
 0x43e   :  { %4631 = vsyncpa [#allocation4], 1 }

</bundles_post_ra>
